<compile_context>
chip_gen: v6e
topology: v6e:2x2x1
jax: 0.10.0
libtpu: 0.0.40
codegen_flags: <defaults>
</compile_context>

<pallas_src>
import jax
import jax.numpy as jnp
from jax import lax
from jax.experimental import pallas as pl
from jax.experimental.pallas import tpu as pltpu


def _round_up(x, m):
    return (x + m - 1) // m * m


def seq2seq_rnn_kernel(
    # inputs
    x_ref,                                   # (T_blk, Bp, I)  time-major block
    wir_ref, wiz_ref, win_ref,               # (I, H) each  (pre-transposed, per gate)
    whr_ref, whz_ref, whn_ref,               # (H, H) each  (pre-transposed, per gate)
    br_ref, bz_ref, bin_ref, bhn_ref,        # (1, H) each
    w1_ref, b1_ref,                          # (H, H1),  (1, H1)
    w2_ref, b2_ref,                          # (H1, H2), (1, H2)
    wo_ref, bo_ref,                          # (H2, Opad), (1, Opad)
    # outputs
    out_ref,                                 # (T_blk, Bp, Opad)
    # scratch
    h_carry,                                 # (Bp, H)        persists across grid
    gxr_s, gxz_s, gxn_s,                     # (T_blk, Bp, H) each
    h_all,                                   # (T_blk, Bp, H)
):
    T_blk, Bp, I = x_ref.shape
    H = h_carry.shape[1]
    compute_dtype = wir_ref.dtype            # f32, or bf16 for MXU inputs

    # h0 = 0 (PyTorch default).  Scratch persists across grid steps, so reset
    # only on the first time block.
    @pl.when(pl.program_id(0) == 0)
    def _():
        h_carry[...] = jnp.zeros_like(h_carry)

    # ---- Phase 1: batched input projection for the whole time block --------
    # One (T_blk*Bp, I) x (I, H) GEMM per gate instead of T tiny per-step
    # matmuls on the serial critical path.  Gates are kept as separate arrays
    # so no 32-lane slicing happens inside the recurrence loop.
    xb = x_ref[...].reshape(T_blk * Bp, I).astype(compute_dtype)
    gxr = jnp.dot(xb, wir_ref[...], preferred_element_type=jnp.float32) + br_ref[...]
    gxz = jnp.dot(xb, wiz_ref[...], preferred_element_type=jnp.float32) + bz_ref[...]
    gxn = jnp.dot(xb, win_ref[...], preferred_element_type=jnp.float32) + bin_ref[...]
    gxr_s[...] = gxr.reshape(T_blk, Bp, H)
    gxz_s[...] = gxz.reshape(T_blk, Bp, H)
    gxn_s[...] = gxn.reshape(T_blk, Bp, H)

    whr = whr_ref[...]
    whz = whz_ref[...]
    whn = whn_ref[...]
    b_hn = bhn_ref[...]

    # ---- Phase 2: the serial GRU recurrence (only h @ W_h* per step) -------
    def step(t, carry):
        h = h_carry[...]                                     # (Bp, H) f32
        hc = h.astype(compute_dtype)
        gh_r = jnp.dot(hc, whr, preferred_element_type=jnp.float32)
        gh_z = jnp.dot(hc, whz, preferred_element_type=jnp.float32)
        gh_n = jnp.dot(hc, whn, preferred_element_type=jnp.float32)

        r = jax.nn.sigmoid(gxr_s[t] + gh_r)
        z = jax.nn.sigmoid(gxz_s[t] + gh_z)
        n = jnp.tanh(gxn_s[t] + r * (gh_n + b_hn))
        h_new = (1.0 - z) * n + z * h

        h_carry[...] = h_new
        h_all[t] = h_new
        return carry

    lax.fori_loop(0, T_blk, step, 0, unroll=True)

    # ---- Phase 3: MLP head batched over the whole time block ---------------
    # relu(outputs) -> (dropout: identity) -> hidden MLP -> output layer.
    # TODO(synk): dropout layers are identity (inference / eval mode).
    a = jnp.maximum(h_all[...].reshape(T_blk * Bp, H), 0.0)
    a = jnp.maximum(
        jnp.dot(a.astype(compute_dtype), w1_ref[...],
                preferred_element_type=jnp.float32) + b1_ref[...], 0.0)
    a = jnp.maximum(
        jnp.dot(a.astype(compute_dtype), w2_ref[...],
                preferred_element_type=jnp.float32) + b2_ref[...], 0.0)
    o = jnp.dot(a.astype(compute_dtype), wo_ref[...],
                preferred_element_type=jnp.float32) + bo_ref[...]

    out_ref[...] = o.reshape(T_blk, Bp, -1).astype(out_ref.dtype)


def seq2seq_rnn_forward(x_bcl, params, *, time_block=8, use_bf16_mxu=False):
    """x_bcl: (B, input_size, seq_len) float32, like the PyTorch module."""
    (w_ih, w_hh, b_ih, b_hh, w1, b1, w2, b2, wo, bo) = params
    B, I, T = x_bcl.shape
    H = w_hh.shape[1]
    O = wo.shape[0]

    # ---- layout preprocessing (done once in XLA, outside the kernel) -------
    Bp = _round_up(B, 8)                 # fill vreg sublanes / MXU rows
    T_blk = min(time_block, T)
    Tp = _round_up(T, T_blk)
    Opad = _round_up(O, 128)             # lane-dense output stores

    # (B, I, T) -> time-major (T, B, I), zero-padded to (Tp, Bp, I).
    x_tbi = jnp.transpose(x_bcl, (2, 0, 1))
    x_tbi = jnp.pad(x_tbi, ((0, Tp - T), (0, Bp - B), (0, 0)))

    # On v6e / v7x set use_bf16_mxu=True: bf16 MXU inputs, f32 accumulation.
    mxu_dtype = jnp.bfloat16 if use_bf16_mxu else jnp.float32
    x_tbi = x_tbi.astype(mxu_dtype)

    # Pre-transposed, per-gate GRU weights (PyTorch packing order is [r,z,n]).
    w_ih_t = w_ih.T.astype(mxu_dtype)                 # (I, 3H)
    w_hh_t = w_hh.T.astype(mxu_dtype)                 # (H, 3H)
    wir, wiz, win = w_ih_t[:, :H], w_ih_t[:, H:2 * H], w_ih_t[:, 2 * H:]
    whr, whz, whn = w_hh_t[:, :H], w_hh_t[:, H:2 * H], w_hh_t[:, 2 * H:]

    # r/z biases can be pre-summed; the n-gate hidden bias must stay inside
    # the r * (W_hn h + b_hn) term.
    b_r = (b_ih[:H] + b_hh[:H]).reshape(1, H)
    b_z = (b_ih[H:2 * H] + b_hh[H:2 * H]).reshape(1, H)
    b_in = b_ih[2 * H:].reshape(1, H)
    b_hn = b_hh[2 * H:].reshape(1, H)

    # Pre-transposed head weights; output layer zero-padded to a lane-dense
    # width so the final store is unmasked.
    w1_t = w1.T.astype(mxu_dtype)                                   # (H, H1)
    w2_t = w2.T.astype(mxu_dtype)                                   # (H1, H2)
    wo_t = jnp.pad(wo.T, ((0, 0), (0, Opad - O))).astype(mxu_dtype)  # (H2, Opad)
    b1_r = b1.reshape(1, -1)
    b2_r = b2.reshape(1, -1)
    bo_r = jnp.pad(bo, (0, Opad - O)).reshape(1, Opad)

    vmem = pltpu.MemorySpace.VMEM
    weight_spec = pl.BlockSpec(memory_space=vmem)

    out_tbo = pl.pallas_call(
        seq2seq_rnn_kernel,
        out_shape=jax.ShapeDtypeStruct((Tp, Bp, Opad), jnp.float32),
        grid_spec=pltpu.PrefetchScalarGridSpec(
            num_scalar_prefetch=0,
            grid=(Tp // T_blk,),
            in_specs=[pl.BlockSpec((T_blk, Bp, I), lambda t: (t, 0, 0))]
                     + [weight_spec] * 16,
            out_specs=pl.BlockSpec((T_blk, Bp, Opad), lambda t: (t, 0, 0)),
            scratch_shapes=[
                pltpu.VMEM((Bp, H), jnp.float32),           # h carry (persists)
                pltpu.VMEM((T_blk, Bp, H), jnp.float32),    # gx_r
                pltpu.VMEM((T_blk, Bp, H), jnp.float32),    # gx_z
                pltpu.VMEM((T_blk, Bp, H), jnp.float32),    # gx_n
                pltpu.VMEM((T_blk, Bp, H), jnp.float32),    # all hidden states
            ],
        ),
        compiler_params=pltpu.CompilerParams(
            # Recurrence over T is sequential -> "arbitrary".
            dimension_semantics=("arbitrary",),
            vmem_limit_bytes=32 * 1024 * 1024,
        ),
    )(x_tbi,
      wir, wiz, win, whr, whz, whn,
      b_r, b_z, b_in, b_hn,
      w1_t, b1_r, w2_t, b2_r, wo_t, bo_r)

    # (Tp, Bp, Opad) -> (B, T, O), matching the PyTorch module's output.
    return jnp.transpose(out_tbo[:T, :B, :O], (1, 0, 2))


def init_params(key, input_size, hidden_size, output_size,
                hidden_layers=(100, 200)):
    """Deterministic synthetic parameters with the same shapes as the module."""
    ks = jax.random.split(key, 10)
    H, I, O = hidden_size, input_size, output_size
    H1, H2 = hidden_layers

    def nrm(k, shape, fan_in):
        return (jax.random.normal(k, shape, jnp.float32)
                * jnp.sqrt(2.0 / fan_in)).astype(jnp.float32)

    w_ih = nrm(ks[0], (3 * H, I), I)          # GRU weight_ih_l0
    w_hh = nrm(ks[1], (3 * H, H), H)          # GRU weight_hh_l0
    b_ih = nrm(ks[2], (3 * H,), H)            # GRU bias_ih_l0
    b_hh = nrm(ks[3], (3 * H,), H)            # GRU bias_hh_l0
    w1 = nrm(ks[4], (H1, H), H)               # hidden_layers[0]
    b1 = jnp.zeros((H1,), jnp.float32)
    w2 = nrm(ks[5], (H2, H1), H1)             # hidden_layers[1]
    b2 = jnp.zeros((H2,), jnp.float32)
    wo = nrm(ks[6], (O, H2), H2)              # output_layer
    bo = jnp.zeros((O,), jnp.float32)
    return (w_ih, w_hh, b_ih, b_hh, w1, b1, w2, b2, wo, bo)


def reference_forward(x_bcl, params):
    """Pure-JAX reference of the PyTorch module (eval mode)."""
    (w_ih, w_hh, b_ih, b_hh, w1, b1, w2, b2, wo, bo) = params
    B, I, T = x_bcl.shape
    H = w_hh.shape[1]
    hp = jax.lax.Precision.HIGHEST
    x_tbi = jnp.transpose(x_bcl, (2, 0, 1))   # (T, B, I)

    def cell(h, xt):
        gx = jnp.dot(xt, w_ih.T, precision=hp) + b_ih
        gh = jnp.dot(h, w_hh.T, precision=hp) + b_hh
        r = jax.nn.sigmoid(gx[:, :H] + gh[:, :H])
        z = jax.nn.sigmoid(gx[:, H:2 * H] + gh[:, H:2 * H])
        n = jnp.tanh(gx[:, 2 * H:] + r * gh[:, 2 * H:])
        h_new = (1.0 - z) * n + z * h
        return h_new, h_new

    h0 = jnp.zeros((B, H), jnp.float32)
    _, hs = lax.scan(cell, h0, x_tbi)               # (T, B, H)
    hs = jnp.transpose(hs, (1, 0, 2))               # (B, T, H)
    a = jnp.maximum(hs, 0.0)
    a = jnp.maximum(jnp.dot(a, w1.T, precision=hp) + b1, 0.0)
    a = jnp.maximum(jnp.dot(a, w2.T, precision=hp) + b2, 0.0)
    return jnp.dot(a, wo.T, precision=hp) + bo


if __name__ == "__main__":
    # Small shapes consistent with the module's forward:
    # x: (batch, input_size, seq_len) -> output: (batch, seq_len, output_size)
    B, I, T = 2, 4, 16
    H, O = 32, 11

    key = jax.random.PRNGKey(0)
    kx, kp = jax.random.split(key)
    x = jax.random.normal(kx, (B, I, T), jnp.float32)
    params = init_params(kp, input_size=I, hidden_size=H, output_size=O)

    out = seq2seq_rnn_forward(x, params)
    out = jax.block_until_ready(out)
    assert out.shape == (B, T, O), out.shape

    ref = reference_forward(x, params)
    max_err = float(jnp.max(jnp.abs(out - ref)))
    assert max_err < 5e-3, f"mismatch vs reference: {max_err}"

    print("KERNEL_OK")
</pallas_src>

<mosaic_0001>
module attributes {stable_mosaic.version = 11 : i64} {
  func.func @seq2seq_rnn_kernel(%arg0: i32, %arg1: memref<8x8x4xf32, #tpu.memory_space<vmem>>, %arg2: memref<4x32xf32, #tpu.memory_space<vmem>>, %arg3: memref<4x32xf32, #tpu.memory_space<vmem>>, %arg4: memref<4x32xf32, #tpu.memory_space<vmem>>, %arg5: memref<32x32xf32, #tpu.memory_space<vmem>>, %arg6: memref<32x32xf32, #tpu.memory_space<vmem>>, %arg7: memref<32x32xf32, #tpu.memory_space<vmem>>, %arg8: memref<1x32xf32, #tpu.memory_space<vmem>>, %arg9: memref<1x32xf32, #tpu.memory_space<vmem>>, %arg10: memref<1x32xf32, #tpu.memory_space<vmem>>, %arg11: memref<1x32xf32, #tpu.memory_space<vmem>>, %arg12: memref<32x100xf32, #tpu.memory_space<vmem>>, %arg13: memref<1x100xf32, #tpu.memory_space<vmem>>, %arg14: memref<100x200xf32, #tpu.memory_space<vmem>>, %arg15: memref<1x200xf32, #tpu.memory_space<vmem>>, %arg16: memref<200x128xf32, #tpu.memory_space<vmem>>, %arg17: memref<1x128xf32, #tpu.memory_space<vmem>>, %arg18: memref<8x8x128xf32, #tpu.memory_space<vmem>>, %arg19: memref<8x32xf32, #tpu.memory_space<vmem>>, %arg20: memref<8x8x32xf32, #tpu.memory_space<vmem>>, %arg21: memref<8x8x32xf32, #tpu.memory_space<vmem>>, %arg22: memref<8x8x32xf32, #tpu.memory_space<vmem>>, %arg23: memref<8x8x32xf32, #tpu.memory_space<vmem>>) attributes {dimension_semantics = [#tpu.dimension_semantics<arbitrary>], iteration_bounds = array<i64: 2>, scalar_prefetch = 0 : i64, scratch_operands = 5 : i64, tpu.core_type = #tpu.core_type<tc>, window_params = [{transform_indices = @transform_0, window_bounds = array<i64: 8, 8, 4>}, {pipeline_mode = #tpu.pipeline_mode<synchronous>, transform_indices = @transform_1, window_bounds = array<i64: 4, 32>}, {pipeline_mode = #tpu.pipeline_mode<synchronous>, transform_indices = @transform_2, window_bounds = array<i64: 4, 32>}, {pipeline_mode = #tpu.pipeline_mode<synchronous>, transform_indices = @transform_3, window_bounds = array<i64: 4, 32>}, {pipeline_mode = #tpu.pipeline_mode<synchronous>, transform_indices = @transform_4, window_bounds = array<i64: 32, 32>}, {pipeline_mode = #tpu.pipeline_mode<synchronous>, transform_indices = @transform_5, window_bounds = array<i64: 32, 32>}, {pipeline_mode = #tpu.pipeline_mode<synchronous>, transform_indices = @transform_6, window_bounds = array<i64: 32, 32>}, {pipeline_mode = #tpu.pipeline_mode<synchronous>, transform_indices = @transform_7, window_bounds = array<i64: 1, 32>}, {pipeline_mode = #tpu.pipeline_mode<synchronous>, transform_indices = @transform_8, window_bounds = array<i64: 1, 32>}, {pipeline_mode = #tpu.pipeline_mode<synchronous>, transform_indices = @transform_9, window_bounds = array<i64: 1, 32>}, {pipeline_mode = #tpu.pipeline_mode<synchronous>, transform_indices = @transform_10, window_bounds = array<i64: 1, 32>}, {pipeline_mode = #tpu.pipeline_mode<synchronous>, transform_indices = @transform_11, window_bounds = array<i64: 32, 100>}, {pipeline_mode = #tpu.pipeline_mode<synchronous>, transform_indices = @transform_12, window_bounds = array<i64: 1, 100>}, {pipeline_mode = #tpu.pipeline_mode<synchronous>, transform_indices = @transform_13, window_bounds = array<i64: 100, 200>}, {pipeline_mode = #tpu.pipeline_mode<synchronous>, transform_indices = @transform_14, window_bounds = array<i64: 1, 200>}, {pipeline_mode = #tpu.pipeline_mode<synchronous>, transform_indices = @transform_15, window_bounds = array<i64: 200, 128>}, {pipeline_mode = #tpu.pipeline_mode<synchronous>, transform_indices = @transform_16, window_bounds = array<i64: 1, 128>}, {transform_indices = @transform_17, window_bounds = array<i64: 8, 8, 128>}]} {
    %c0_i32 = arith.constant 0 : i32
    %0 = arith.cmpi eq, %arg0, %c0_i32 : i32
    %1 = arith.extui %0 : i1 to i32
    %c0_i32_0 = arith.constant 0 : i32
    %2 = arith.cmpi ne, %1, %c0_i32_0 : i32
    scf.if %2 {
      %cst_203 = arith.constant 0.000000e+00 : f32
      %375 = vector.broadcast %cst_203 : f32 to vector<8x32xf32>
      %c0_204 = arith.constant 0 : index
      %c0_205 = arith.constant 0 : index
      %376 = vector.load %arg19[%c0_204, %c0_205] : memref<8x32xf32, #tpu.memory_space<vmem>>, vector<8x32xf32>
      tpu.vector_store %arg19[%c0_204, %c0_205], %375 {strides = array<i32>} : memref<8x32xf32, #tpu.memory_space<vmem>>, vector<8x32xf32>,
    } else {
    }
    %c0 = arith.constant 0 : index
    %c0_1 = arith.constant 0 : index
    %c0_2 = arith.constant 0 : index
    %3 = vector.load %arg1[%c0, %c0_1, %c0_2] : memref<8x8x4xf32, #tpu.memory_space<vmem>>, vector<8x8x4xf32>
    %4 = vector.shape_cast %3 : vector<8x8x4xf32> to vector<64x4xf32>
    %c0_3 = arith.constant 0 : index
    %c0_4 = arith.constant 0 : index
    %5 = vector.load %arg2[%c0_3, %c0_4] : memref<4x32xf32, #tpu.memory_space<vmem>>, vector<4x32xf32>
    %cst = arith.constant dense<0.000000e+00> : vector<64x32xf32>
    %6 = tpu.matmul %4, %5, %cst {dimension_numbers = #tpu.dot_dimension_numbers<[1], [0], [0], [1], [0, 0, 1, 1], [], []>} : vector<64x4xf32>, vector<4x32xf32>, vector<64x32xf32> -> vector<64x32xf32>
    %c0_5 = arith.constant 0 : index
    %c0_6 = arith.constant 0 : index
    %7 = vector.load %arg8[%c0_5, %c0_6] : memref<1x32xf32, #tpu.memory_space<vmem>>, vector<1x32xf32>
    %8 = vector.broadcast %7 : vector<1x32xf32> to vector<64x32xf32>
    %9 = arith.addf %6, %8 : vector<64x32xf32>
    %c0_7 = arith.constant 0 : index
    %c0_8 = arith.constant 0 : index
    %10 = vector.load %arg3[%c0_7, %c0_8] : memref<4x32xf32, #tpu.memory_space<vmem>>, vector<4x32xf32>
    %cst_9 = arith.constant dense<0.000000e+00> : vector<64x32xf32>
    %11 = tpu.matmul %4, %10, %cst_9 {dimension_numbers = #tpu.dot_dimension_numbers<[1], [0], [0], [1], [0, 0, 1, 1], [], []>} : vector<64x4xf32>, vector<4x32xf32>, vector<64x32xf32> -> vector<64x32xf32>
    %c0_10 = arith.constant 0 : index
    %c0_11 = arith.constant 0 : index
    %12 = vector.load %arg9[%c0_10, %c0_11] : memref<1x32xf32, #tpu.memory_space<vmem>>, vector<1x32xf32>
    %13 = vector.broadcast %12 : vector<1x32xf32> to vector<64x32xf32>
    %14 = arith.addf %11, %13 : vector<64x32xf32>
    %c0_12 = arith.constant 0 : index
    %c0_13 = arith.constant 0 : index
    %15 = vector.load %arg4[%c0_12, %c0_13] : memref<4x32xf32, #tpu.memory_space<vmem>>, vector<4x32xf32>
    %cst_14 = arith.constant dense<0.000000e+00> : vector<64x32xf32>
    %16 = tpu.matmul %4, %15, %cst_14 {dimension_numbers = #tpu.dot_dimension_numbers<[1], [0], [0], [1], [0, 0, 1, 1], [], []>} : vector<64x4xf32>, vector<4x32xf32>, vector<64x32xf32> -> vector<64x32xf32>
    %c0_15 = arith.constant 0 : index
    %c0_16 = arith.constant 0 : index
    %17 = vector.load %arg10[%c0_15, %c0_16] : memref<1x32xf32, #tpu.memory_space<vmem>>, vector<1x32xf32>
    %18 = vector.broadcast %17 : vector<1x32xf32> to vector<64x32xf32>
    %19 = arith.addf %16, %18 : vector<64x32xf32>
    %20 = vector.shape_cast %9 : vector<64x32xf32> to vector<8x8x32xf32>
    %c0_17 = arith.constant 0 : index
    %c0_18 = arith.constant 0 : index
    %c0_19 = arith.constant 0 : index
    %21 = vector.load %arg20[%c0_17, %c0_18, %c0_19] : memref<8x8x32xf32, #tpu.memory_space<vmem>>, vector<8x8x32xf32>
    tpu.vector_store %arg20[%c0_17, %c0_18, %c0_19], %20 {strides = array<i32>} : memref<8x8x32xf32, #tpu.memory_space<vmem>>, vector<8x8x32xf32>,
    %22 = vector.shape_cast %14 : vector<64x32xf32> to vector<8x8x32xf32>
    %c0_20 = arith.constant 0 : index
    %c0_21 = arith.constant 0 : index
    %c0_22 = arith.constant 0 : index
    %23 = vector.load %arg21[%c0_20, %c0_21, %c0_22] : memref<8x8x32xf32, #tpu.memory_space<vmem>>, vector<8x8x32xf32>
    tpu.vector_store %arg21[%c0_20, %c0_21, %c0_22], %22 {strides = array<i32>} : memref<8x8x32xf32, #tpu.memory_space<vmem>>, vector<8x8x32xf32>,
    %24 = vector.shape_cast %19 : vector<64x32xf32> to vector<8x8x32xf32>
    %c0_23 = arith.constant 0 : index
    %c0_24 = arith.constant 0 : index
    %c0_25 = arith.constant 0 : index
    %25 = vector.load %arg22[%c0_23, %c0_24, %c0_25] : memref<8x8x32xf32, #tpu.memory_space<vmem>>, vector<8x8x32xf32>
    tpu.vector_store %arg22[%c0_23, %c0_24, %c0_25], %24 {strides = array<i32>} : memref<8x8x32xf32, #tpu.memory_space<vmem>>, vector<8x8x32xf32>,
    %c0_26 = arith.constant 0 : index
    %c0_27 = arith.constant 0 : index
    %26 = vector.load %arg5[%c0_26, %c0_27] : memref<32x32xf32, #tpu.memory_space<vmem>>, vector<32x32xf32>
    %c0_28 = arith.constant 0 : index
    %c0_29 = arith.constant 0 : index
    %27 = vector.load %arg6[%c0_28, %c0_29] : memref<32x32xf32, #tpu.memory_space<vmem>>, vector<32x32xf32>
    %c0_30 = arith.constant 0 : index
    %c0_31 = arith.constant 0 : index
    %28 = vector.load %arg7[%c0_30, %c0_31] : memref<32x32xf32, #tpu.memory_space<vmem>>, vector<32x32xf32>
    %c0_32 = arith.constant 0 : index
    %c0_33 = arith.constant 0 : index
    %29 = vector.load %arg11[%c0_32, %c0_33] : memref<1x32xf32, #tpu.memory_space<vmem>>, vector<1x32xf32>
    %c0_i32_34 = arith.constant 0 : i32
    %c0_35 = arith.constant 0 : index
    %c0_36 = arith.constant 0 : index
    %30 = vector.load %arg19[%c0_35, %c0_36] : memref<8x32xf32, #tpu.memory_space<vmem>>, vector<8x32xf32>
    %cst_37 = arith.constant dense<0.000000e+00> : vector<8x32xf32>
    %31 = tpu.matmul %30, %26, %cst_37 {dimension_numbers = #tpu.dot_dimension_numbers<[1], [0], [0], [1], [0, 0, 1, 1], [], []>} : vector<8x32xf32>, vector<32x32xf32>, vector<8x32xf32> -> vector<8x32xf32>
    %cst_38 = arith.constant dense<0.000000e+00> : vector<8x32xf32>
    %32 = tpu.matmul %30, %27, %cst_38 {dimension_numbers = #tpu.dot_dimension_numbers<[1], [0], [0], [1], [0, 0, 1, 1], [], []>} : vector<8x32xf32>, vector<32x32xf32>, vector<8x32xf32> -> vector<8x32xf32>
    %cst_39 = arith.constant dense<0.000000e+00> : vector<8x32xf32>
    %33 = tpu.matmul %30, %28, %cst_39 {dimension_numbers = #tpu.dot_dimension_numbers<[1], [0], [0], [1], [0, 0, 1, 1], [], []>} : vector<8x32xf32>, vector<32x32xf32>, vector<8x32xf32> -> vector<8x32xf32>
    %34 = arith.index_cast %c0_i32_34 : i32 to index
    %c0_40 = arith.constant 0 : index
    %c0_41 = arith.constant 0 : index
    %35 = vector.load %arg20[%34, %c0_40, %c0_41] : memref<8x8x32xf32, #tpu.memory_space<vmem>>, vector<1x8x32xf32>
    %36 = vector.shape_cast %35 : vector<1x8x32xf32> to vector<8x32xf32>
    %37 = arith.addf %36, %31 : vector<8x32xf32>
    %38 = arith.negf %37 : vector<8x32xf32>
    %39 = math.exp %38 : vector<8x32xf32>
    %cst_42 = arith.constant 1.000000e+00 : f32
    %40 = vector.broadcast %cst_42 : f32 to vector<8x32xf32>
    %41 = arith.addf %40, %39 : vector<8x32xf32>
    %42 = arith.divf %40, %41 : vector<8x32xf32>
    %43 = arith.index_cast %c0_i32_34 : i32 to index
    %c0_43 = arith.constant 0 : index
    %c0_44 = arith.constant 0 : index
    %44 = vector.load %arg21[%43, %c0_43, %c0_44] : memref<8x8x32xf32, #tpu.memory_space<vmem>>, vector<1x8x32xf32>
    %45 = vector.shape_cast %44 : vector<1x8x32xf32> to vector<8x32xf32>
    %46 = arith.addf %45, %32 : vector<8x32xf32>
    %47 = arith.negf %46 : vector<8x32xf32>
    %48 = math.exp %47 : vector<8x32xf32>
    %cst_45 = arith.constant 1.000000e+00 : f32
    %49 = vector.broadcast %cst_45 : f32 to vector<8x32xf32>
    %50 = arith.addf %49, %48 : vector<8x32xf32>
    %51 = arith.divf %49, %50 : vector<8x32xf32>
    %52 = arith.index_cast %c0_i32_34 : i32 to index
    %c0_46 = arith.constant 0 : index
    %c0_47 = arith.constant 0 : index
    %53 = vector.load %arg22[%52, %c0_46, %c0_47] : memref<8x8x32xf32, #tpu.memory_space<vmem>>, vector<1x8x32xf32>
    %54 = vector.shape_cast %53 : vector<1x8x32xf32> to vector<8x32xf32>
    %55 = vector.broadcast %29 : vector<1x32xf32> to vector<8x32xf32>
    %56 = arith.addf %33, %55 : vector<8x32xf32>
    %57 = arith.mulf %42, %56 : vector<8x32xf32>
    %58 = arith.addf %54, %57 : vector<8x32xf32>
    %59 = math.tanh %58 : vector<8x32xf32>
    %cst_48 = arith.constant 1.000000e+00 : f32
    %60 = vector.broadcast %cst_48 : f32 to vector<8x32xf32>
    %61 = arith.subf %60, %51 : vector<8x32xf32>
    %62 = arith.mulf %61, %59 : vector<8x32xf32>
    %63 = arith.mulf %51, %30 : vector<8x32xf32>
    %64 = arith.addf %62, %63 : vector<8x32xf32>
    %c0_49 = arith.constant 0 : index
    %c0_50 = arith.constant 0 : index
    %65 = vector.load %arg19[%c0_49, %c0_50] : memref<8x32xf32, #tpu.memory_space<vmem>>, vector<8x32xf32>
    tpu.vector_store %arg19[%c0_49, %c0_50], %64 {strides = array<i32>} : memref<8x32xf32, #tpu.memory_space<vmem>>, vector<8x32xf32>,
    %66 = arith.index_cast %c0_i32_34 : i32 to index
    %c0_51 = arith.constant 0 : index
    %c0_52 = arith.constant 0 : index
    %67 = vector.load %arg23[%66, %c0_51, %c0_52] : memref<8x8x32xf32, #tpu.memory_space<vmem>>, vector<1x8x32xf32>
    %68 = vector.shape_cast %67 : vector<1x8x32xf32> to vector<8x32xf32>
    %69 = vector.shape_cast %64 : vector<8x32xf32> to vector<1x8x32xf32>
    tpu.vector_store %arg23[%66, %c0_51, %c0_52], %69 {strides = array<i32>} : memref<8x8x32xf32, #tpu.memory_space<vmem>>, vector<1x8x32xf32>,
    %c1_i32 = arith.constant 1 : i32
    %c0_53 = arith.constant 0 : index
    %c0_54 = arith.constant 0 : index
    %70 = vector.load %arg19[%c0_53, %c0_54] : memref<8x32xf32, #tpu.memory_space<vmem>>, vector<8x32xf32>
    %cst_55 = arith.constant dense<0.000000e+00> : vector<8x32xf32>
    %71 = tpu.matmul %70, %26, %cst_55 {dimension_numbers = #tpu.dot_dimension_numbers<[1], [0], [0], [1], [0, 0, 1, 1], [], []>} : vector<8x32xf32>, vector<32x32xf32>, vector<8x32xf32> -> vector<8x32xf32>
    %cst_56 = arith.constant dense<0.000000e+00> : vector<8x32xf32>
    %72 = tpu.matmul %70, %27, %cst_56 {dimension_numbers = #tpu.dot_dimension_numbers<[1], [0], [0], [1], [0, 0, 1, 1], [], []>} : vector<8x32xf32>, vector<32x32xf32>, vector<8x32xf32> -> vector<8x32xf32>
    %cst_57 = arith.constant dense<0.000000e+00> : vector<8x32xf32>
    %73 = tpu.matmul %70, %28, %cst_57 {dimension_numbers = #tpu.dot_dimension_numbers<[1], [0], [0], [1], [0, 0, 1, 1], [], []>} : vector<8x32xf32>, vector<32x32xf32>, vector<8x32xf32> -> vector<8x32xf32>
    %74 = arith.index_cast %c1_i32 : i32 to index
    %c0_58 = arith.constant 0 : index
    %c0_59 = arith.constant 0 : index
    %75 = vector.load %arg20[%74, %c0_58, %c0_59] : memref<8x8x32xf32, #tpu.memory_space<vmem>>, vector<1x8x32xf32>
    %76 = vector.shape_cast %75 : vector<1x8x32xf32> to vector<8x32xf32>
    %77 = arith.addf %76, %71 : vector<8x32xf32>
    %78 = arith.negf %77 : vector<8x32xf32>
    %79 = math.exp %78 : vector<8x32xf32>
    %cst_60 = arith.constant 1.000000e+00 : f32
    %80 = vector.broadcast %cst_60 : f32 to vector<8x32xf32>
    %81 = arith.addf %80, %79 : vector<8x32xf32>
    %82 = arith.divf %80, %81 : vector<8x32xf32>
    %83 = arith.index_cast %c1_i32 : i32 to index
    %c0_61 = arith.constant 0 : index
    %c0_62 = arith.constant 0 : index
    %84 = vector.load %arg21[%83, %c0_61, %c0_62] : memref<8x8x32xf32, #tpu.memory_space<vmem>>, vector<1x8x32xf32>
    %85 = vector.shape_cast %84 : vector<1x8x32xf32> to vector<8x32xf32>
    %86 = arith.addf %85, %72 : vector<8x32xf32>
    %87 = arith.negf %86 : vector<8x32xf32>
    %88 = math.exp %87 : vector<8x32xf32>
    %cst_63 = arith.constant 1.000000e+00 : f32
    %89 = vector.broadcast %cst_63 : f32 to vector<8x32xf32>
    %90 = arith.addf %89, %88 : vector<8x32xf32>
    %91 = arith.divf %89, %90 : vector<8x32xf32>
    %92 = arith.index_cast %c1_i32 : i32 to index
    %c0_64 = arith.constant 0 : index
    %c0_65 = arith.constant 0 : index
    %93 = vector.load %arg22[%92, %c0_64, %c0_65] : memref<8x8x32xf32, #tpu.memory_space<vmem>>, vector<1x8x32xf32>
    %94 = vector.shape_cast %93 : vector<1x8x32xf32> to vector<8x32xf32>
    %95 = vector.broadcast %29 : vector<1x32xf32> to vector<8x32xf32>
    %96 = arith.addf %73, %95 : vector<8x32xf32>
    %97 = arith.mulf %82, %96 : vector<8x32xf32>
    %98 = arith.addf %94, %97 : vector<8x32xf32>
    %99 = math.tanh %98 : vector<8x32xf32>
    %cst_66 = arith.constant 1.000000e+00 : f32
    %100 = vector.broadcast %cst_66 : f32 to vector<8x32xf32>
    %101 = arith.subf %100, %91 : vector<8x32xf32>
    %102 = arith.mulf %101, %99 : vector<8x32xf32>
    %103 = arith.mulf %91, %70 : vector<8x32xf32>
    %104 = arith.addf %102, %103 : vector<8x32xf32>
    %c0_67 = arith.constant 0 : index
    %c0_68 = arith.constant 0 : index
    %105 = vector.load %arg19[%c0_67, %c0_68] : memref<8x32xf32, #tpu.memory_space<vmem>>, vector<8x32xf32>
    tpu.vector_store %arg19[%c0_67, %c0_68], %104 {strides = array<i32>} : memref<8x32xf32, #tpu.memory_space<vmem>>, vector<8x32xf32>,
    %106 = arith.index_cast %c1_i32 : i32 to index
    %c0_69 = arith.constant 0 : index
    %c0_70 = arith.constant 0 : index
    %107 = vector.load %arg23[%106, %c0_69, %c0_70] : memref<8x8x32xf32, #tpu.memory_space<vmem>>, vector<1x8x32xf32>
    %108 = vector.shape_cast %107 : vector<1x8x32xf32> to vector<8x32xf32>
    %109 = vector.shape_cast %104 : vector<8x32xf32> to vector<1x8x32xf32>
    tpu.vector_store %arg23[%106, %c0_69, %c0_70], %109 {strides = array<i32>} : memref<8x8x32xf32, #tpu.memory_space<vmem>>, vector<1x8x32xf32>,
    %c2_i32 = arith.constant 2 : i32
    %c0_71 = arith.constant 0 : index
    %c0_72 = arith.constant 0 : index
    %110 = vector.load %arg19[%c0_71, %c0_72] : memref<8x32xf32, #tpu.memory_space<vmem>>, vector<8x32xf32>
    %cst_73 = arith.constant dense<0.000000e+00> : vector<8x32xf32>
    %111 = tpu.matmul %110, %26, %cst_73 {dimension_numbers = #tpu.dot_dimension_numbers<[1], [0], [0], [1], [0, 0, 1, 1], [], []>} : vector<8x32xf32>, vector<32x32xf32>, vector<8x32xf32> -> vector<8x32xf32>
    %cst_74 = arith.constant dense<0.000000e+00> : vector<8x32xf32>
    %112 = tpu.matmul %110, %27, %cst_74 {dimension_numbers = #tpu.dot_dimension_numbers<[1], [0], [0], [1], [0, 0, 1, 1], [], []>} : vector<8x32xf32>, vector<32x32xf32>, vector<8x32xf32> -> vector<8x32xf32>
    %cst_75 = arith.constant dense<0.000000e+00> : vector<8x32xf32>
    %113 = tpu.matmul %110, %28, %cst_75 {dimension_numbers = #tpu.dot_dimension_numbers<[1], [0], [0], [1], [0, 0, 1, 1], [], []>} : vector<8x32xf32>, vector<32x32xf32>, vector<8x32xf32> -> vector<8x32xf32>
    %114 = arith.index_cast %c2_i32 : i32 to index
    %c0_76 = arith.constant 0 : index
    %c0_77 = arith.constant 0 : index
    %115 = vector.load %arg20[%114, %c0_76, %c0_77] : memref<8x8x32xf32, #tpu.memory_space<vmem>>, vector<1x8x32xf32>
    %116 = vector.shape_cast %115 : vector<1x8x32xf32> to vector<8x32xf32>
    %117 = arith.addf %116, %111 : vector<8x32xf32>
    %118 = arith.negf %117 : vector<8x32xf32>
    %119 = math.exp %118 : vector<8x32xf32>
    %cst_78 = arith.constant 1.000000e+00 : f32
    %120 = vector.broadcast %cst_78 : f32 to vector<8x32xf32>
    %121 = arith.addf %120, %119 : vector<8x32xf32>
    %122 = arith.divf %120, %121 : vector<8x32xf32>
    %123 = arith.index_cast %c2_i32 : i32 to index
    %c0_79 = arith.constant 0 : index
    %c0_80 = arith.constant 0 : index
    %124 = vector.load %arg21[%123, %c0_79, %c0_80] : memref<8x8x32xf32, #tpu.memory_space<vmem>>, vector<1x8x32xf32>
    %125 = vector.shape_cast %124 : vector<1x8x32xf32> to vector<8x32xf32>
    %126 = arith.addf %125, %112 : vector<8x32xf32>
    %127 = arith.negf %126 : vector<8x32xf32>
    %128 = math.exp %127 : vector<8x32xf32>
    %cst_81 = arith.constant 1.000000e+00 : f32
    %129 = vector.broadcast %cst_81 : f32 to vector<8x32xf32>
    %130 = arith.addf %129, %128 : vector<8x32xf32>
    %131 = arith.divf %129, %130 : vector<8x32xf32>
    %132 = arith.index_cast %c2_i32 : i32 to index
    %c0_82 = arith.constant 0 : index
    %c0_83 = arith.constant 0 : index
    %133 = vector.load %arg22[%132, %c0_82, %c0_83] : memref<8x8x32xf32, #tpu.memory_space<vmem>>, vector<1x8x32xf32>
    %134 = vector.shape_cast %133 : vector<1x8x32xf32> to vector<8x32xf32>
    %135 = vector.broadcast %29 : vector<1x32xf32> to vector<8x32xf32>
    %136 = arith.addf %113, %135 : vector<8x32xf32>
    %137 = arith.mulf %122, %136 : vector<8x32xf32>
    %138 = arith.addf %134, %137 : vector<8x32xf32>
    %139 = math.tanh %138 : vector<8x32xf32>
    %cst_84 = arith.constant 1.000000e+00 : f32
    %140 = vector.broadcast %cst_84 : f32 to vector<8x32xf32>
    %141 = arith.subf %140, %131 : vector<8x32xf32>
    %142 = arith.mulf %141, %139 : vector<8x32xf32>
    %143 = arith.mulf %131, %110 : vector<8x32xf32>
    %144 = arith.addf %142, %143 : vector<8x32xf32>
    %c0_85 = arith.constant 0 : index
    %c0_86 = arith.constant 0 : index
    %145 = vector.load %arg19[%c0_85, %c0_86] : memref<8x32xf32, #tpu.memory_space<vmem>>, vector<8x32xf32>
    tpu.vector_store %arg19[%c0_85, %c0_86], %144 {strides = array<i32>} : memref<8x32xf32, #tpu.memory_space<vmem>>, vector<8x32xf32>,
    %146 = arith.index_cast %c2_i32 : i32 to index
    %c0_87 = arith.constant 0 : index
    %c0_88 = arith.constant 0 : index
    %147 = vector.load %arg23[%146, %c0_87, %c0_88] : memref<8x8x32xf32, #tpu.memory_space<vmem>>, vector<1x8x32xf32>
    %148 = vector.shape_cast %147 : vector<1x8x32xf32> to vector<8x32xf32>
    %149 = vector.shape_cast %144 : vector<8x32xf32> to vector<1x8x32xf32>
    tpu.vector_store %arg23[%146, %c0_87, %c0_88], %149 {strides = array<i32>} : memref<8x8x32xf32, #tpu.memory_space<vmem>>, vector<1x8x32xf32>,
    %c3_i32 = arith.constant 3 : i32
    %c0_89 = arith.constant 0 : index
    %c0_90 = arith.constant 0 : index
    %150 = vector.load %arg19[%c0_89, %c0_90] : memref<8x32xf32, #tpu.memory_space<vmem>>, vector<8x32xf32>
    %cst_91 = arith.constant dense<0.000000e+00> : vector<8x32xf32>
    %151 = tpu.matmul %150, %26, %cst_91 {dimension_numbers = #tpu.dot_dimension_numbers<[1], [0], [0], [1], [0, 0, 1, 1], [], []>} : vector<8x32xf32>, vector<32x32xf32>, vector<8x32xf32> -> vector<8x32xf32>
    %cst_92 = arith.constant dense<0.000000e+00> : vector<8x32xf32>
    %152 = tpu.matmul %150, %27, %cst_92 {dimension_numbers = #tpu.dot_dimension_numbers<[1], [0], [0], [1], [0, 0, 1, 1], [], []>} : vector<8x32xf32>, vector<32x32xf32>, vector<8x32xf32> -> vector<8x32xf32>
    %cst_93 = arith.constant dense<0.000000e+00> : vector<8x32xf32>
    %153 = tpu.matmul %150, %28, %cst_93 {dimension_numbers = #tpu.dot_dimension_numbers<[1], [0], [0], [1], [0, 0, 1, 1], [], []>} : vector<8x32xf32>, vector<32x32xf32>, vector<8x32xf32> -> vector<8x32xf32>
    %154 = arith.index_cast %c3_i32 : i32 to index
    %c0_94 = arith.constant 0 : index
    %c0_95 = arith.constant 0 : index
    %155 = vector.load %arg20[%154, %c0_94, %c0_95] : memref<8x8x32xf32, #tpu.memory_space<vmem>>, vector<1x8x32xf32>
    %156 = vector.shape_cast %155 : vector<1x8x32xf32> to vector<8x32xf32>
    %157 = arith.addf %156, %151 : vector<8x32xf32>
    %158 = arith.negf %157 : vector<8x32xf32>
    %159 = math.exp %158 : vector<8x32xf32>
    %cst_96 = arith.constant 1.000000e+00 : f32
    %160 = vector.broadcast %cst_96 : f32 to vector<8x32xf32>
    %161 = arith.addf %160, %159 : vector<8x32xf32>
    %162 = arith.divf %160, %161 : vector<8x32xf32>
    %163 = arith.index_cast %c3_i32 : i32 to index
    %c0_97 = arith.constant 0 : index
    %c0_98 = arith.constant 0 : index
    %164 = vector.load %arg21[%163, %c0_97, %c0_98] : memref<8x8x32xf32, #tpu.memory_space<vmem>>, vector<1x8x32xf32>
    %165 = vector.shape_cast %164 : vector<1x8x32xf32> to vector<8x32xf32>
    %166 = arith.addf %165, %152 : vector<8x32xf32>
    %167 = arith.negf %166 : vector<8x32xf32>
    %168 = math.exp %167 : vector<8x32xf32>
    %cst_99 = arith.constant 1.000000e+00 : f32
    %169 = vector.broadcast %cst_99 : f32 to vector<8x32xf32>
    %170 = arith.addf %169, %168 : vector<8x32xf32>
    %171 = arith.divf %169, %170 : vector<8x32xf32>
    %172 = arith.index_cast %c3_i32 : i32 to index
    %c0_100 = arith.constant 0 : index
    %c0_101 = arith.constant 0 : index
    %173 = vector.load %arg22[%172, %c0_100, %c0_101] : memref<8x8x32xf32, #tpu.memory_space<vmem>>, vector<1x8x32xf32>
    %174 = vector.shape_cast %173 : vector<1x8x32xf32> to vector<8x32xf32>
    %175 = vector.broadcast %29 : vector<1x32xf32> to vector<8x32xf32>
    %176 = arith.addf %153, %175 : vector<8x32xf32>
    %177 = arith.mulf %162, %176 : vector<8x32xf32>
    %178 = arith.addf %174, %177 : vector<8x32xf32>
    %179 = math.tanh %178 : vector<8x32xf32>
    %cst_102 = arith.constant 1.000000e+00 : f32
    %180 = vector.broadcast %cst_102 : f32 to vector<8x32xf32>
    %181 = arith.subf %180, %171 : vector<8x32xf32>
    %182 = arith.mulf %181, %179 : vector<8x32xf32>
    %183 = arith.mulf %171, %150 : vector<8x32xf32>
    %184 = arith.addf %182, %183 : vector<8x32xf32>
    %c0_103 = arith.constant 0 : index
    %c0_104 = arith.constant 0 : index
    %185 = vector.load %arg19[%c0_103, %c0_104] : memref<8x32xf32, #tpu.memory_space<vmem>>, vector<8x32xf32>
    tpu.vector_store %arg19[%c0_103, %c0_104], %184 {strides = array<i32>} : memref<8x32xf32, #tpu.memory_space<vmem>>, vector<8x32xf32>,
    %186 = arith.index_cast %c3_i32 : i32 to index
    %c0_105 = arith.constant 0 : index
    %c0_106 = arith.constant 0 : index
    %187 = vector.load %arg23[%186, %c0_105, %c0_106] : memref<8x8x32xf32, #tpu.memory_space<vmem>>, vector<1x8x32xf32>
    %188 = vector.shape_cast %187 : vector<1x8x32xf32> to vector<8x32xf32>
    %189 = vector.shape_cast %184 : vector<8x32xf32> to vector<1x8x32xf32>
    tpu.vector_store %arg23[%186, %c0_105, %c0_106], %189 {strides = array<i32>} : memref<8x8x32xf32, #tpu.memory_space<vmem>>, vector<1x8x32xf32>,
    %c4_i32 = arith.constant 4 : i32
    %c0_107 = arith.constant 0 : index
    %c0_108 = arith.constant 0 : index
    %190 = vector.load %arg19[%c0_107, %c0_108] : memref<8x32xf32, #tpu.memory_space<vmem>>, vector<8x32xf32>
    %cst_109 = arith.constant dense<0.000000e+00> : vector<8x32xf32>
    %191 = tpu.matmul %190, %26, %cst_109 {dimension_numbers = #tpu.dot_dimension_numbers<[1], [0], [0], [1], [0, 0, 1, 1], [], []>} : vector<8x32xf32>, vector<32x32xf32>, vector<8x32xf32> -> vector<8x32xf32>
    %cst_110 = arith.constant dense<0.000000e+00> : vector<8x32xf32>
    %192 = tpu.matmul %190, %27, %cst_110 {dimension_numbers = #tpu.dot_dimension_numbers<[1], [0], [0], [1], [0, 0, 1, 1], [], []>} : vector<8x32xf32>, vector<32x32xf32>, vector<8x32xf32> -> vector<8x32xf32>
    %cst_111 = arith.constant dense<0.000000e+00> : vector<8x32xf32>
    %193 = tpu.matmul %190, %28, %cst_111 {dimension_numbers = #tpu.dot_dimension_numbers<[1], [0], [0], [1], [0, 0, 1, 1], [], []>} : vector<8x32xf32>, vector<32x32xf32>, vector<8x32xf32> -> vector<8x32xf32>
    %194 = arith.index_cast %c4_i32 : i32 to index
    %c0_112 = arith.constant 0 : index
    %c0_113 = arith.constant 0 : index
    %195 = vector.load %arg20[%194, %c0_112, %c0_113] : memref<8x8x32xf32, #tpu.memory_space<vmem>>, vector<1x8x32xf32>
    %196 = vector.shape_cast %195 : vector<1x8x32xf32> to vector<8x32xf32>
    %197 = arith.addf %196, %191 : vector<8x32xf32>
    %198 = arith.negf %197 : vector<8x32xf32>
    %199 = math.exp %198 : vector<8x32xf32>
    %cst_114 = arith.constant 1.000000e+00 : f32
    %200 = vector.broadcast %cst_114 : f32 to vector<8x32xf32>
    %201 = arith.addf %200, %199 : vector<8x32xf32>
    %202 = arith.divf %200, %201 : vector<8x32xf32>
    %203 = arith.index_cast %c4_i32 : i32 to index
    %c0_115 = arith.constant 0 : index
    %c0_116 = arith.constant 0 : index
    %204 = vector.load %arg21[%203, %c0_115, %c0_116] : memref<8x8x32xf32, #tpu.memory_space<vmem>>, vector<1x8x32xf32>
    %205 = vector.shape_cast %204 : vector<1x8x32xf32> to vector<8x32xf32>
    %206 = arith.addf %205, %192 : vector<8x32xf32>
    %207 = arith.negf %206 : vector<8x32xf32>
    %208 = math.exp %207 : vector<8x32xf32>
    %cst_117 = arith.constant 1.000000e+00 : f32
    %209 = vector.broadcast %cst_117 : f32 to vector<8x32xf32>
    %210 = arith.addf %209, %208 : vector<8x32xf32>
    %211 = arith.divf %209, %210 : vector<8x32xf32>
    %212 = arith.index_cast %c4_i32 : i32 to index
    %c0_118 = arith.constant 0 : index
    %c0_119 = arith.constant 0 : index
    %213 = vector.load %arg22[%212, %c0_118, %c0_119] : memref<8x8x32xf32, #tpu.memory_space<vmem>>, vector<1x8x32xf32>
    %214 = vector.shape_cast %213 : vector<1x8x32xf32> to vector<8x32xf32>
    %215 = vector.broadcast %29 : vector<1x32xf32> to vector<8x32xf32>
    %216 = arith.addf %193, %215 : vector<8x32xf32>
    %217 = arith.mulf %202, %216 : vector<8x32xf32>
    %218 = arith.addf %214, %217 : vector<8x32xf32>
    %219 = math.tanh %218 : vector<8x32xf32>
    %cst_120 = arith.constant 1.000000e+00 : f32
    %220 = vector.broadcast %cst_120 : f32 to vector<8x32xf32>
    %221 = arith.subf %220, %211 : vector<8x32xf32>
    %222 = arith.mulf %221, %219 : vector<8x32xf32>
    %223 = arith.mulf %211, %190 : vector<8x32xf32>
    %224 = arith.addf %222, %223 : vector<8x32xf32>
    %c0_121 = arith.constant 0 : index
    %c0_122 = arith.constant 0 : index
    %225 = vector.load %arg19[%c0_121, %c0_122] : memref<8x32xf32, #tpu.memory_space<vmem>>, vector<8x32xf32>
    tpu.vector_store %arg19[%c0_121, %c0_122], %224 {strides = array<i32>} : memref<8x32xf32, #tpu.memory_space<vmem>>, vector<8x32xf32>,
    %226 = arith.index_cast %c4_i32 : i32 to index
    %c0_123 = arith.constant 0 : index
    %c0_124 = arith.constant 0 : index
    %227 = vector.load %arg23[%226, %c0_123, %c0_124] : memref<8x8x32xf32, #tpu.memory_space<vmem>>, vector<1x8x32xf32>
    %228 = vector.shape_cast %227 : vector<1x8x32xf32> to vector<8x32xf32>
    %229 = vector.shape_cast %224 : vector<8x32xf32> to vector<1x8x32xf32>
    tpu.vector_store %arg23[%226, %c0_123, %c0_124], %229 {strides = array<i32>} : memref<8x8x32xf32, #tpu.memory_space<vmem>>, vector<1x8x32xf32>,
    %c5_i32 = arith.constant 5 : i32
    %c0_125 = arith.constant 0 : index
    %c0_126 = arith.constant 0 : index
    %230 = vector.load %arg19[%c0_125, %c0_126] : memref<8x32xf32, #tpu.memory_space<vmem>>, vector<8x32xf32>
    %cst_127 = arith.constant dense<0.000000e+00> : vector<8x32xf32>
    %231 = tpu.matmul %230, %26, %cst_127 {dimension_numbers = #tpu.dot_dimension_numbers<[1], [0], [0], [1], [0, 0, 1, 1], [], []>} : vector<8x32xf32>, vector<32x32xf32>, vector<8x32xf32> -> vector<8x32xf32>
    %cst_128 = arith.constant dense<0.000000e+00> : vector<8x32xf32>
    %232 = tpu.matmul %230, %27, %cst_128 {dimension_numbers = #tpu.dot_dimension_numbers<[1], [0], [0], [1], [0, 0, 1, 1], [], []>} : vector<8x32xf32>, vector<32x32xf32>, vector<8x32xf32> -> vector<8x32xf32>
    %cst_129 = arith.constant dense<0.000000e+00> : vector<8x32xf32>
    %233 = tpu.matmul %230, %28, %cst_129 {dimension_numbers = #tpu.dot_dimension_numbers<[1], [0], [0], [1], [0, 0, 1, 1], [], []>} : vector<8x32xf32>, vector<32x32xf32>, vector<8x32xf32> -> vector<8x32xf32>
    %234 = arith.index_cast %c5_i32 : i32 to index
    %c0_130 = arith.constant 0 : index
    %c0_131 = arith.constant 0 : index
    %235 = vector.load %arg20[%234, %c0_130, %c0_131] : memref<8x8x32xf32, #tpu.memory_space<vmem>>, vector<1x8x32xf32>
    %236 = vector.shape_cast %235 : vector<1x8x32xf32> to vector<8x32xf32>
    %237 = arith.addf %236, %231 : vector<8x32xf32>
    %238 = arith.negf %237 : vector<8x32xf32>
    %239 = math.exp %238 : vector<8x32xf32>
    %cst_132 = arith.constant 1.000000e+00 : f32
    %240 = vector.broadcast %cst_132 : f32 to vector<8x32xf32>
    %241 = arith.addf %240, %239 : vector<8x32xf32>
    %242 = arith.divf %240, %241 : vector<8x32xf32>
    %243 = arith.index_cast %c5_i32 : i32 to index
    %c0_133 = arith.constant 0 : index
    %c0_134 = arith.constant 0 : index
    %244 = vector.load %arg21[%243, %c0_133, %c0_134] : memref<8x8x32xf32, #tpu.memory_space<vmem>>, vector<1x8x32xf32>
    %245 = vector.shape_cast %244 : vector<1x8x32xf32> to vector<8x32xf32>
    %246 = arith.addf %245, %232 : vector<8x32xf32>
    %247 = arith.negf %246 : vector<8x32xf32>
    %248 = math.exp %247 : vector<8x32xf32>
    %cst_135 = arith.constant 1.000000e+00 : f32
    %249 = vector.broadcast %cst_135 : f32 to vector<8x32xf32>
    %250 = arith.addf %249, %248 : vector<8x32xf32>
    %251 = arith.divf %249, %250 : vector<8x32xf32>
    %252 = arith.index_cast %c5_i32 : i32 to index
    %c0_136 = arith.constant 0 : index
    %c0_137 = arith.constant 0 : index
    %253 = vector.load %arg22[%252, %c0_136, %c0_137] : memref<8x8x32xf32, #tpu.memory_space<vmem>>, vector<1x8x32xf32>
    %254 = vector.shape_cast %253 : vector<1x8x32xf32> to vector<8x32xf32>
    %255 = vector.broadcast %29 : vector<1x32xf32> to vector<8x32xf32>
    %256 = arith.addf %233, %255 : vector<8x32xf32>
    %257 = arith.mulf %242, %256 : vector<8x32xf32>
    %258 = arith.addf %254, %257 : vector<8x32xf32>
    %259 = math.tanh %258 : vector<8x32xf32>
    %cst_138 = arith.constant 1.000000e+00 : f32
    %260 = vector.broadcast %cst_138 : f32 to vector<8x32xf32>
    %261 = arith.subf %260, %251 : vector<8x32xf32>
    %262 = arith.mulf %261, %259 : vector<8x32xf32>
    %263 = arith.mulf %251, %230 : vector<8x32xf32>
    %264 = arith.addf %262, %263 : vector<8x32xf32>
    %c0_139 = arith.constant 0 : index
    %c0_140 = arith.constant 0 : index
    %265 = vector.load %arg19[%c0_139, %c0_140] : memref<8x32xf32, #tpu.memory_space<vmem>>, vector<8x32xf32>
    tpu.vector_store %arg19[%c0_139, %c0_140], %264 {strides = array<i32>} : memref<8x32xf32, #tpu.memory_space<vmem>>, vector<8x32xf32>,
    %266 = arith.index_cast %c5_i32 : i32 to index
    %c0_141 = arith.constant 0 : index
    %c0_142 = arith.constant 0 : index
    %267 = vector.load %arg23[%266, %c0_141, %c0_142] : memref<8x8x32xf32, #tpu.memory_space<vmem>>, vector<1x8x32xf32>
    %268 = vector.shape_cast %267 : vector<1x8x32xf32> to vector<8x32xf32>
    %269 = vector.shape_cast %264 : vector<8x32xf32> to vector<1x8x32xf32>
    tpu.vector_store %arg23[%266, %c0_141, %c0_142], %269 {strides = array<i32>} : memref<8x8x32xf32, #tpu.memory_space<vmem>>, vector<1x8x32xf32>,
    %c6_i32 = arith.constant 6 : i32
    %c0_143 = arith.constant 0 : index
    %c0_144 = arith.constant 0 : index
    %270 = vector.load %arg19[%c0_143, %c0_144] : memref<8x32xf32, #tpu.memory_space<vmem>>, vector<8x32xf32>
    %cst_145 = arith.constant dense<0.000000e+00> : vector<8x32xf32>
    %271 = tpu.matmul %270, %26, %cst_145 {dimension_numbers = #tpu.dot_dimension_numbers<[1], [0], [0], [1], [0, 0, 1, 1], [], []>} : vector<8x32xf32>, vector<32x32xf32>, vector<8x32xf32> -> vector<8x32xf32>
    %cst_146 = arith.constant dense<0.000000e+00> : vector<8x32xf32>
    %272 = tpu.matmul %270, %27, %cst_146 {dimension_numbers = #tpu.dot_dimension_numbers<[1], [0], [0], [1], [0, 0, 1, 1], [], []>} : vector<8x32xf32>, vector<32x32xf32>, vector<8x32xf32> -> vector<8x32xf32>
    %cst_147 = arith.constant dense<0.000000e+00> : vector<8x32xf32>
    %273 = tpu.matmul %270, %28, %cst_147 {dimension_numbers = #tpu.dot_dimension_numbers<[1], [0], [0], [1], [0, 0, 1, 1], [], []>} : vector<8x32xf32>, vector<32x32xf32>, vector<8x32xf32> -> vector<8x32xf32>
    %274 = arith.index_cast %c6_i32 : i32 to index
    %c0_148 = arith.constant 0 : index
    %c0_149 = arith.constant 0 : index
    %275 = vector.load %arg20[%274, %c0_148, %c0_149] : memref<8x8x32xf32, #tpu.memory_space<vmem>>, vector<1x8x32xf32>
    %276 = vector.shape_cast %275 : vector<1x8x32xf32> to vector<8x32xf32>
    %277 = arith.addf %276, %271 : vector<8x32xf32>
    %278 = arith.negf %277 : vector<8x32xf32>
    %279 = math.exp %278 : vector<8x32xf32>
    %cst_150 = arith.constant 1.000000e+00 : f32
    %280 = vector.broadcast %cst_150 : f32 to vector<8x32xf32>
    %281 = arith.addf %280, %279 : vector<8x32xf32>
    %282 = arith.divf %280, %281 : vector<8x32xf32>
    %283 = arith.index_cast %c6_i32 : i32 to index
    %c0_151 = arith.constant 0 : index
    %c0_152 = arith.constant 0 : index
    %284 = vector.load %arg21[%283, %c0_151, %c0_152] : memref<8x8x32xf32, #tpu.memory_space<vmem>>, vector<1x8x32xf32>
    %285 = vector.shape_cast %284 : vector<1x8x32xf32> to vector<8x32xf32>
    %286 = arith.addf %285, %272 : vector<8x32xf32>
    %287 = arith.negf %286 : vector<8x32xf32>
    %288 = math.exp %287 : vector<8x32xf32>
    %cst_153 = arith.constant 1.000000e+00 : f32
    %289 = vector.broadcast %cst_153 : f32 to vector<8x32xf32>
    %290 = arith.addf %289, %288 : vector<8x32xf32>
    %291 = arith.divf %289, %290 : vector<8x32xf32>
    %292 = arith.index_cast %c6_i32 : i32 to index
    %c0_154 = arith.constant 0 : index
    %c0_155 = arith.constant 0 : index
    %293 = vector.load %arg22[%292, %c0_154, %c0_155] : memref<8x8x32xf32, #tpu.memory_space<vmem>>, vector<1x8x32xf32>
    %294 = vector.shape_cast %293 : vector<1x8x32xf32> to vector<8x32xf32>
    %295 = vector.broadcast %29 : vector<1x32xf32> to vector<8x32xf32>
    %296 = arith.addf %273, %295 : vector<8x32xf32>
    %297 = arith.mulf %282, %296 : vector<8x32xf32>
    %298 = arith.addf %294, %297 : vector<8x32xf32>
    %299 = math.tanh %298 : vector<8x32xf32>
    %cst_156 = arith.constant 1.000000e+00 : f32
    %300 = vector.broadcast %cst_156 : f32 to vector<8x32xf32>
    %301 = arith.subf %300, %291 : vector<8x32xf32>
    %302 = arith.mulf %301, %299 : vector<8x32xf32>
    %303 = arith.mulf %291, %270 : vector<8x32xf32>
    %304 = arith.addf %302, %303 : vector<8x32xf32>
    %c0_157 = arith.constant 0 : index
    %c0_158 = arith.constant 0 : index
    %305 = vector.load %arg19[%c0_157, %c0_158] : memref<8x32xf32, #tpu.memory_space<vmem>>, vector<8x32xf32>
    tpu.vector_store %arg19[%c0_157, %c0_158], %304 {strides = array<i32>} : memref<8x32xf32, #tpu.memory_space<vmem>>, vector<8x32xf32>,
    %306 = arith.index_cast %c6_i32 : i32 to index
    %c0_159 = arith.constant 0 : index
    %c0_160 = arith.constant 0 : index
    %307 = vector.load %arg23[%306, %c0_159, %c0_160] : memref<8x8x32xf32, #tpu.memory_space<vmem>>, vector<1x8x32xf32>
    %308 = vector.shape_cast %307 : vector<1x8x32xf32> to vector<8x32xf32>
    %309 = vector.shape_cast %304 : vector<8x32xf32> to vector<1x8x32xf32>
    tpu.vector_store %arg23[%306, %c0_159, %c0_160], %309 {strides = array<i32>} : memref<8x8x32xf32, #tpu.memory_space<vmem>>, vector<1x8x32xf32>,
    %c7_i32 = arith.constant 7 : i32
    %c0_161 = arith.constant 0 : index
    %c0_162 = arith.constant 0 : index
    %310 = vector.load %arg19[%c0_161, %c0_162] : memref<8x32xf32, #tpu.memory_space<vmem>>, vector<8x32xf32>
    %cst_163 = arith.constant dense<0.000000e+00> : vector<8x32xf32>
    %311 = tpu.matmul %310, %26, %cst_163 {dimension_numbers = #tpu.dot_dimension_numbers<[1], [0], [0], [1], [0, 0, 1, 1], [], []>} : vector<8x32xf32>, vector<32x32xf32>, vector<8x32xf32> -> vector<8x32xf32>
    %cst_164 = arith.constant dense<0.000000e+00> : vector<8x32xf32>
    %312 = tpu.matmul %310, %27, %cst_164 {dimension_numbers = #tpu.dot_dimension_numbers<[1], [0], [0], [1], [0, 0, 1, 1], [], []>} : vector<8x32xf32>, vector<32x32xf32>, vector<8x32xf32> -> vector<8x32xf32>
    %cst_165 = arith.constant dense<0.000000e+00> : vector<8x32xf32>
    %313 = tpu.matmul %310, %28, %cst_165 {dimension_numbers = #tpu.dot_dimension_numbers<[1], [0], [0], [1], [0, 0, 1, 1], [], []>} : vector<8x32xf32>, vector<32x32xf32>, vector<8x32xf32> -> vector<8x32xf32>
    %314 = arith.index_cast %c7_i32 : i32 to index
    %c0_166 = arith.constant 0 : index
    %c0_167 = arith.constant 0 : index
    %315 = vector.load %arg20[%314, %c0_166, %c0_167] : memref<8x8x32xf32, #tpu.memory_space<vmem>>, vector<1x8x32xf32>
    %316 = vector.shape_cast %315 : vector<1x8x32xf32> to vector<8x32xf32>
    %317 = arith.addf %316, %311 : vector<8x32xf32>
    %318 = arith.negf %317 : vector<8x32xf32>
    %319 = math.exp %318 : vector<8x32xf32>
    %cst_168 = arith.constant 1.000000e+00 : f32
    %320 = vector.broadcast %cst_168 : f32 to vector<8x32xf32>
    %321 = arith.addf %320, %319 : vector<8x32xf32>
    %322 = arith.divf %320, %321 : vector<8x32xf32>
    %323 = arith.index_cast %c7_i32 : i32 to index
    %c0_169 = arith.constant 0 : index
    %c0_170 = arith.constant 0 : index
    %324 = vector.load %arg21[%323, %c0_169, %c0_170] : memref<8x8x32xf32, #tpu.memory_space<vmem>>, vector<1x8x32xf32>
    %325 = vector.shape_cast %324 : vector<1x8x32xf32> to vector<8x32xf32>
    %326 = arith.addf %325, %312 : vector<8x32xf32>
    %327 = arith.negf %326 : vector<8x32xf32>
    %328 = math.exp %327 : vector<8x32xf32>
    %cst_171 = arith.constant 1.000000e+00 : f32
    %329 = vector.broadcast %cst_171 : f32 to vector<8x32xf32>
    %330 = arith.addf %329, %328 : vector<8x32xf32>
    %331 = arith.divf %329, %330 : vector<8x32xf32>
    %332 = arith.index_cast %c7_i32 : i32 to index
    %c0_172 = arith.constant 0 : index
    %c0_173 = arith.constant 0 : index
    %333 = vector.load %arg22[%332, %c0_172, %c0_173] : memref<8x8x32xf32, #tpu.memory_space<vmem>>, vector<1x8x32xf32>
    %334 = vector.shape_cast %333 : vector<1x8x32xf32> to vector<8x32xf32>
    %335 = vector.broadcast %29 : vector<1x32xf32> to vector<8x32xf32>
    %336 = arith.addf %313, %335 : vector<8x32xf32>
    %337 = arith.mulf %322, %336 : vector<8x32xf32>
    %338 = arith.addf %334, %337 : vector<8x32xf32>
    %339 = math.tanh %338 : vector<8x32xf32>
    %cst_174 = arith.constant 1.000000e+00 : f32
    %340 = vector.broadcast %cst_174 : f32 to vector<8x32xf32>
    %341 = arith.subf %340, %331 : vector<8x32xf32>
    %342 = arith.mulf %341, %339 : vector<8x32xf32>
    %343 = arith.mulf %331, %310 : vector<8x32xf32>
    %344 = arith.addf %342, %343 : vector<8x32xf32>
    %c0_175 = arith.constant 0 : index
    %c0_176 = arith.constant 0 : index
    %345 = vector.load %arg19[%c0_175, %c0_176] : memref<8x32xf32, #tpu.memory_space<vmem>>, vector<8x32xf32>
    tpu.vector_store %arg19[%c0_175, %c0_176], %344 {strides = array<i32>} : memref<8x32xf32, #tpu.memory_space<vmem>>, vector<8x32xf32>,
    %346 = arith.index_cast %c7_i32 : i32 to index
    %c0_177 = arith.constant 0 : index
    %c0_178 = arith.constant 0 : index
    %347 = vector.load %arg23[%346, %c0_177, %c0_178] : memref<8x8x32xf32, #tpu.memory_space<vmem>>, vector<1x8x32xf32>
    %348 = vector.shape_cast %347 : vector<1x8x32xf32> to vector<8x32xf32>
    %349 = vector.shape_cast %344 : vector<8x32xf32> to vector<1x8x32xf32>
    tpu.vector_store %arg23[%346, %c0_177, %c0_178], %349 {strides = array<i32>} : memref<8x8x32xf32, #tpu.memory_space<vmem>>, vector<1x8x32xf32>,
    %c8_i32 = arith.constant 8 : i32
    %c0_179 = arith.constant 0 : index
    %c0_180 = arith.constant 0 : index
    %c0_181 = arith.constant 0 : index
    %350 = vector.load %arg23[%c0_179, %c0_180, %c0_181] : memref<8x8x32xf32, #tpu.memory_space<vmem>>, vector<8x8x32xf32>
    %351 = vector.shape_cast %350 : vector<8x8x32xf32> to vector<64x32xf32>
    %cst_182 = arith.constant 0.000000e+00 : f32
    %352 = vector.broadcast %cst_182 : f32 to vector<64x32xf32>
    %353 = arith.maximumf %351, %352 : vector<64x32xf32>
    %c0_183 = arith.constant 0 : index
    %c0_184 = arith.constant 0 : index
    %354 = vector.load %arg12[%c0_183, %c0_184] : memref<32x100xf32, #tpu.memory_space<vmem>>, vector<32x100xf32>
    %cst_185 = arith.constant dense<0.000000e+00> : vector<64x100xf32>
    %355 = tpu.matmul %353, %354, %cst_185 {dimension_numbers = #tpu.dot_dimension_numbers<[1], [0], [0], [1], [0, 0, 1, 1], [], []>} : vector<64x32xf32>, vector<32x100xf32>, vector<64x100xf32> -> vector<64x100xf32>
    %c0_186 = arith.constant 0 : index
    %c0_187 = arith.constant 0 : index
    %356 = vector.load %arg13[%c0_186, %c0_187] : memref<1x100xf32, #tpu.memory_space<vmem>>, vector<1x100xf32>
    %357 = vector.broadcast %356 : vector<1x100xf32> to vector<64x100xf32>
    %358 = arith.addf %355, %357 : vector<64x100xf32>
    %cst_188 = arith.constant 0.000000e+00 : f32
    %359 = vector.broadcast %cst_188 : f32 to vector<64x100xf32>
    %360 = arith.maximumf %358, %359 : vector<64x100xf32>
    %c0_189 = arith.constant 0 : index
    %c0_190 = arith.constant 0 : index
    %361 = vector.load %arg14[%c0_189, %c0_190] : memref<100x200xf32, #tpu.memory_space<vmem>>, vector<100x200xf32>
    %cst_191 = arith.constant dense<0.000000e+00> : vector<64x200xf32>
    %362 = tpu.matmul %360, %361, %cst_191 {dimension_numbers = #tpu.dot_dimension_numbers<[1], [0], [0], [1], [0, 0, 1, 1], [], []>} : vector<64x100xf32>, vector<100x200xf32>, vector<64x200xf32> -> vector<64x200xf32>
    %c0_192 = arith.constant 0 : index
    %c0_193 = arith.constant 0 : index
    %363 = vector.load %arg15[%c0_192, %c0_193] : memref<1x200xf32, #tpu.memory_space<vmem>>, vector<1x200xf32>
    %364 = vector.broadcast %363 : vector<1x200xf32> to vector<64x200xf32>
    %365 = arith.addf %362, %364 : vector<64x200xf32>
    %cst_194 = arith.constant 0.000000e+00 : f32
    %366 = vector.broadcast %cst_194 : f32 to vector<64x200xf32>
    %367 = arith.maximumf %365, %366 : vector<64x200xf32>
    %c0_195 = arith.constant 0 : index
    %c0_196 = arith.constant 0 : index
    %368 = vector.load %arg16[%c0_195, %c0_196] : memref<200x128xf32, #tpu.memory_space<vmem>>, vector<200x128xf32>
    %cst_197 = arith.constant dense<0.000000e+00> : vector<64x128xf32>
    %369 = tpu.matmul %367, %368, %cst_197 {dimension_numbers = #tpu.dot_dimension_numbers<[1], [0], [0], [1], [0, 0, 1, 1], [], []>} : vector<64x200xf32>, vector<200x128xf32>, vector<64x128xf32> -> vector<64x128xf32>
    %c0_198 = arith.constant 0 : index
    %c0_199 = arith.constant 0 : index
    %370 = vector.load %arg17[%c0_198, %c0_199] : memref<1x128xf32, #tpu.memory_space<vmem>>, vector<1x128xf32>
    %371 = vector.broadcast %370 : vector<1x128xf32> to vector<64x128xf32>
    %372 = arith.addf %369, %371 : vector<64x128xf32>
    %373 = vector.shape_cast %372 : vector<64x128xf32> to vector<8x8x128xf32>
    %c0_200 = arith.constant 0 : index
    %c0_201 = arith.constant 0 : index
    %c0_202 = arith.constant 0 : index
    %374 = vector.load %arg18[%c0_200, %c0_201, %c0_202] : memref<8x8x128xf32, #tpu.memory_space<vmem>>, vector<8x8x128xf32>
    tpu.vector_store %arg18[%c0_200, %c0_201, %c0_202], %373 {strides = array<i32>} : memref<8x8x128xf32, #tpu.memory_space<vmem>>, vector<8x8x128xf32>,
    return
  }
  func.func @transform_0(%arg0: i32) -> (i32, i32, i32) {
    %c0_i32 = arith.constant 0 : i32
    %c0_i32_0 = arith.constant 0 : i32
    %c0_i32_1 = arith.constant 0 : i32
    return %arg0, %c0_i32, %c0_i32_0 : i32, i32, i32
  }
  func.func @transform_1(%arg0: i32) -> (i32, i32) {
    %c0_i32 = arith.constant 0 : i32
    %c0_i32_0 = arith.constant 0 : i32
    %c0_i32_1 = arith.constant 0 : i32
    return %c0_i32, %c0_i32_0 : i32, i32
  }
  func.func @transform_2(%arg0: i32) -> (i32, i32) {
    %c0_i32 = arith.constant 0 : i32
    %c0_i32_0 = arith.constant 0 : i32
    %c0_i32_1 = arith.constant 0 : i32
    return %c0_i32, %c0_i32_0 : i32, i32
  }
  func.func @transform_3(%arg0: i32) -> (i32, i32) {
    %c0_i32 = arith.constant 0 : i32
    %c0_i32_0 = arith.constant 0 : i32
    %c0_i32_1 = arith.constant 0 : i32
    return %c0_i32, %c0_i32_0 : i32, i32
  }
  func.func @transform_4(%arg0: i32) -> (i32, i32) {
    %c0_i32 = arith.constant 0 : i32
    %c0_i32_0 = arith.constant 0 : i32
    %c0_i32_1 = arith.constant 0 : i32
    return %c0_i32, %c0_i32_0 : i32, i32
  }
  func.func @transform_5(%arg0: i32) -> (i32, i32) {
    %c0_i32 = arith.constant 0 : i32
    %c0_i32_0 = arith.constant 0 : i32
    %c0_i32_1 = arith.constant 0 : i32
    return %c0_i32, %c0_i32_0 : i32, i32
  }
  func.func @transform_6(%arg0: i32) -> (i32, i32) {
    %c0_i32 = arith.constant 0 : i32
    %c0_i32_0 = arith.constant 0 : i32
    %c0_i32_1 = arith.constant 0 : i32
    return %c0_i32, %c0_i32_0 : i32, i32
  }
  func.func @transform_7(%arg0: i32) -> (i32, i32) {
    %c0_i32 = arith.constant 0 : i32
    %c0_i32_0 = arith.constant 0 : i32
    %c0_i32_1 = arith.constant 0 : i32
    return %c0_i32, %c0_i32_0 : i32, i32
  }
  func.func @transform_8(%arg0: i32) -> (i32, i32) {
    %c0_i32 = arith.constant 0 : i32
    %c0_i32_0 = arith.constant 0 : i32
    %c0_i32_1 = arith.constant 0 : i32
    return %c0_i32, %c0_i32_0 : i32, i32
  }
  func.func @transform_9(%arg0: i32) -> (i32, i32) {
    %c0_i32 = arith.constant 0 : i32
    %c0_i32_0 = arith.constant 0 : i32
    %c0_i32_1 = arith.constant 0 : i32
    return %c0_i32, %c0_i32_0 : i32, i32
  }
  func.func @transform_10(%arg0: i32) -> (i32, i32) {
    %c0_i32 = arith.constant 0 : i32
    %c0_i32_0 = arith.constant 0 : i32
    %c0_i32_1 = arith.constant 0 : i32
    return %c0_i32, %c0_i32_0 : i32, i32
  }
  func.func @transform_11(%arg0: i32) -> (i32, i32) {
    %c0_i32 = arith.constant 0 : i32
    %c0_i32_0 = arith.constant 0 : i32
    %c0_i32_1 = arith.constant 0 : i32
    return %c0_i32, %c0_i32_0 : i32, i32
  }
  func.func @transform_12(%arg0: i32) -> (i32, i32) {
    %c0_i32 = arith.constant 0 : i32
    %c0_i32_0 = arith.constant 0 : i32
    %c0_i32_1 = arith.constant 0 : i32
    return %c0_i32, %c0_i32_0 : i32, i32
  }
  func.func @transform_13(%arg0: i32) -> (i32, i32) {
    %c0_i32 = arith.constant 0 : i32
    %c0_i32_0 = arith.constant 0 : i32
    %c0_i32_1 = arith.constant 0 : i32
    return %c0_i32, %c0_i32_0 : i32, i32
  }
  func.func @transform_14(%arg0: i32) -> (i32, i32) {
    %c0_i32 = arith.constant 0 : i32
    %c0_i32_0 = arith.constant 0 : i32
    %c0_i32_1 = arith.constant 0 : i32
    return %c0_i32, %c0_i32_0 : i32, i32
  }
  func.func @transform_15(%arg0: i32) -> (i32, i32) {
    %c0_i32 = arith.constant 0 : i32
    %c0_i32_0 = arith.constant 0 : i32
    %c0_i32_1 = arith.constant 0 : i32
    return %c0_i32, %c0_i32_0 : i32, i32
  }
  func.func @transform_16(%arg0: i32) -> (i32, i32) {
    %c0_i32 = arith.constant 0 : i32
    %c0_i32_0 = arith.constant 0 : i32
    %c0_i32_1 = arith.constant 0 : i32
    return %c0_i32, %c0_i32_0 : i32, i32
  }
  func.func @transform_17(%arg0: i32) -> (i32, i32, i32) {
    %c0_i32 = arith.constant 0 : i32
    %c0_i32_0 = arith.constant 0 : i32
    %c0_i32_1 = arith.constant 0 : i32
    return %arg0, %c0_i32, %c0_i32_0 : i32, i32, i32
  }
}

</mosaic_0001>

<bundles_post_ra>
// kernel: tpu_custom_call.1
= control target key start
LH: loop header
LB: loop body
LE: loop exit
PB: predicated region body
PF: predicated region fallthrough
CT: control target
= control target key end

     0   :  { %s5278_s0 = inlined_call_operand.vmem [shape: f32[16,8,4], index: 0, kind: input, shape index: {}]   ;;  %s5279_s1 = inlined_call_operand.vmem [shape: f32[4,32], index: 1, kind: input, shape index: {}]   ;;  %s5280_s2 = inlined_call_operand.vmem [shape: f32[4,32], index: 2, kind: input, shape index: {}]   ;;  %s5281_s3 = inlined_call_operand.vmem [shape: f32[4,32], index: 3, kind: input, shape index: {}]   ;;  %s5282_s4 = inlined_call_operand.vmem [shape: f32[32,32], index: 4, kind: input, shape index: {}]   ;;  %s5283_s5 = inlined_call_operand.vmem [shape: f32[32,32], index: 5, kind: input, shape index: {}]   ;;  %s5284_s6 = inlined_call_operand.vmem [shape: f32[32,32], index: 6, kind: input, shape index: {}]   ;;  %s5285_s7 = inlined_call_operand.vmem [shape: f32[1,32], index: 7, kind: input, shape index: {}]   ;;  %s5286_s8 = inlined_call_operand.vmem [shape: f32[1,32], index: 8, kind: input, shape index: {}]   ;;  %s5287_s9 = inlined_call_operand.vmem [shape: f32[1,32], index: 9, kind: input, shape index: {}]   ;;  %s5288_s10 = inlined_call_operand.vmem [shape: f32[1,32], index: 10, kind: input, shape index: {}]   ;;  %s5289_s11 = inlined_call_operand.vmem [shape: f32[32,100], index: 11, kind: input, shape index: {}]   ;;  %s5290_s12 = inlined_call_operand.vmem [shape: f32[1,100], index: 12, kind: input, shape index: {}]   ;;  %s5291_s13 = inlined_call_operand.vmem [shape: f32[100,200], index: 13, kind: input, shape index: {}]   ;;  %s5292_s14 = inlined_call_operand.vmem [shape: f32[1,200], index: 14, kind: input, shape index: {}]   ;;  %s5293_s15 = inlined_call_operand.vmem [shape: f32[200,128], index: 15, kind: input, shape index: {}]   ;;  %s5294_s16 = inlined_call_operand.vmem [shape: f32[1,128], index: 16, kind: input, shape index: {}]   ;;  %s5295_s17 = inlined_call_operand.hbm [shape: f32[16,8,128], index: 17, kind: output, shape index: {}]  }
   0x1   :  { %5302 = sst [smem:[#allocation15_spill]] %s5278_s0 }
   0x2   :  { %5303 = sst [smem:[#allocation16_spill]] %s5279_s1 }
   0x3   :  { %22 = vsyncpa [#allocation8], 0 }
   0x4   :  { %24 = vsyncpa [#allocation8 + $0x1], 0  ;;  %s4423_s24 = smov 0   ;;  %s4425_s25 = smov 0  }
   0x5   :  { %s4427_s26 = smov 0   ;;  %s4429_s27 = smov 0  }
   0x6 LB: > { %5304 = sst [smem:[#allocation10_spill]] %s4313_s24  ;;  %s4444_s28 = sadd.s32 4294967295, %s4325_s27   ;;  %s4325_s27 = sphi %s4429_s27, %s5316_s27   ;;  %s4321_s26 = sphi %s4427_s26, %s5318_s26   ;;  %s4317_s25 = sphi %s4425_s25, %s5320_s25   ;;  %s4313_s24 = sphi %s4423_s24, %s5319_s24  }
   0x7   : > { %5305 = sst [smem:[#allocation11_spill]] %s4321_s26  ;;  %s3538_s29 = sadd.s32 4294967294, %s4325_s27  }
   0x8   : > { %s4448_s0 = sadd.s32 1, %s4325_s27   ;;  %s399_s30 = sadd.s32 1, %s4321_s26 }
   0x9   : > { %5306 = sst [smem:[#allocation12_spill]] %s4448_s0  ;;  %s396_s18 = ssub.s32 %s4325_s27, %s4448_s0 }
   0xa   : > { %p409_p0 = scmp.ne.s32.totalorder %s4321_s26, %s4317_s25  ;;  %p397_p1 = scmp.eq.s32.totalorder %s396_s18, 0 }
   0xb   : > { %p410_p2 = scmp.eq.s32.totalorder %s4444_s28, 1  ;;  %p415_p3 = scmp.ne.s32.totalorder %s4317_s25, %s4313_s24 }
   0xc   : > { %p416_p4 = scmp.eq.s32.totalorder %s3538_s29, 1  ;;  %p3541_p7 = scmp.ge.s32.totalorder %s4325_s27, 1 }
   0xd   : > { %s4459_s19 = scalar_select %p397_p1, %s4321_s26, %s399_s30  }
   0xe   : > { %p4461_p5 = por %p410_p2, %p409_p0  ;;  %p4465_p6 = por %p416_p4, %p415_p3 }
   0xf   : > { %5307 = sst [smem:[#allocation13_spill]] %s4459_s19  ;;  %p491_p8 = scmp.lt.s32.totalorder %s4325_s27, 3 }
  0x10   : > { %s5309_s20 = scalar_select %p4465_p6, 1, 0 }
  0x11   : > { %p492_p9 = pnand %p3541_p7, %p491_p8 }
  0x12   : > { %5310 = sst [smem:[#allocation14_spill]] %s5309_s20  ;;  %s5301_s21 = sand.u32 (!%p492_p9), 1, %s4317_s25  }
  0x13   : > { %495 = sbr.rel (%p492_p9) target bundleno = 2742 (0xab6), region = 88  ;;  %s3543_s22 = sshll.u32 (!%p492_p9), %s4444_s28, 3 }
  0x14   : > { %s3542_s23 = sshll.u32 (!%p492_p9), %s5301_s21, 6  ;;  %p544_p10 = scmp.lt.s32.totalorder (!%p492_p9), %s3543_s22, 15 }
  0x15   : > { %s5311_s19 = sld [smem:[#allocation15_spill]] (!%p492_p9)  ;;  %s4480_s0 = scalar_lea.vmem (!%p492_p9), [#allocation7], %s3542_s23 }
  0x16   : > { %p3545_p11 = scmp.ne.s32.totalorder (!%p492_p9), %s4444_s28, 0 }
  0x18   : > { %s5322_s22 = smov (!%p544_p10, %s3543_s22), 15  ;;  %553 = sbr.rel (%p3545_p11) target bundleno = 31 (0x1f), region = 92 }
  0x19   : > { %s3544_s29 = sshll.u32 %s5322_s22, 3 }
  0x1b   : > { %s4478_s26 = scalar_lea.vmem %s5311_s19, %s3544_s29 }
  0x1d   : > { %vm554_vm0 = vcmask 261120   ;;  %v4327_v0 = vmov 0.0  }
  0x1e   : > { %555 = vst.msk [vmem:[#allocation2] sm:$0xff] %vm554_vm0, %v4327_v0 }
  0x1f PF: > { %s5312_s21 = sld [smem:[#allocation16_spill]]  ;;  %vm597_vm1 = vcmask 1043456   ;;  %v556_v2 = vld [vmem:[%s4478_s26] sm:$0xff]  ;;  %vm572_vm2 = vcmask 31744   ;;  %v557_v3 = vld [vmem:[%s4478_s26 + $0x8] sm:$0xff]  ;;  %v558_v5 = vld [vmem:[%s4478_s26 + $0x10] sm:$0xff] }
  0x20   : > { %3812 = vmatprep.mubr.msk.f32.mxu1 %vm572_vm2, %v556_v2  ;;  %v706_v4 = vld [vmem:[%s5280_s2] sm:$0xf]  ;;  %3840 = vmatprep.mubr.msk.f32.mxu0 %vm572_vm2, %v556_v2  ;;  %v559_v6 = vld [vmem:[%s4478_s26 + $0x18] sm:$0xff]  ;;  %v4328_v8 = vmov 0.0   ;;  %v561_v11 = vld [vmem:[%s4478_s26 + $0x28] sm:$0xff]  ;;  %vm4329_vm3 = vmmov 0  }
  0x21   : > { %v560_v7 = vld [vmem:[%s4478_s26 + $0x20] sm:$0xff]  ;;  %v4511_v10 = vld [vmem:[%s5284_s6 + $0x18] sm:$0xff]  ;;  %v562_v12 = vld [vmem:[%s4478_s26 + $0x30] sm:$0xff]  ;;  %vm938_vm4 = vcmask 261120   ;;  %vm3132_vm5 = vcmask 818176   ;;  %vm3324_vm6 = vcmask 588800  }
  0x22   : > { %v822_v9 = vld [vmem:[%s5281_s3] sm:$0xf]  ;;  %v4522_v13 = vld [vmem:[%s5284_s6 + $0x10] sm:$0xff]  ;;  %v4531_v14 = vld [vmem:[%s5284_s6 + $0x8] sm:$0xff]  ;;  %s3476_s20 = sshll.u32 %s4480_s0, 4  ;;  %s5313_s30 = sand.u32 1, %s4317_s25   ;;  %s5233_s20 = int_to_ptr.vmem [resolvable:$true] %s3476_s20 }
  0x23   : > { %3838 = vmatprep.subr.msk.mxu0 %vm597_vm1, %v822_v9  ;;  %v563_v15 = vld [vmem:[%s4478_s26 + $0x38] sm:$0xff]  ;;  %v4541_v16 = vld [vmem:[%s5284_s6] sm:$0xff]  ;;  %v4561_v18 = vld [vmem:[%s5282_s4 + $0x10] sm:$0xff]  ;;  %s3650_s26 = sshll.u32 %s4444_s28, 10  ;;  %s5238_s18 = scalar_lea.sflag [#allocation8], %s5313_s30 }
  0x24   : > { %3839 = vmatpush3.msk.msra.mxu0 %vm597_vm1, %v822_v9  ;;  %v4552_v17 = vld [vmem:[%s5282_s4 + $0x18] sm:$0xff]  ;;  %v4569_v19 = vld [vmem:[%s5282_s4 + $0x8] sm:$0xff]  ;;  %v4580_v20 = vld [vmem:[%s5282_s4] sm:$0xff]  ;;  %s5231_s29 = scalar_lea.hbm %s5295_s17, %s3650_s26  ;;  %s4265_s28 = scalar_lea.vmem %s5233_s20, 1024 }
  0x25   : > { %v564_v1 = vld [vmem:[%s5312_s21] sm:$0xf]  ;;  %3841 = vmatmul.mubr.msk.f32.vlgmr.msra.gmra.mxu0 %vm572_vm2, %v557_v3  ;;  %3874 = vmatprep.subr.mxu0 %v4328_v8  ;;  %v4590_v22 = vld [vmem:[%s5283_s5 + $0x18] sm:$0xff]  ;;  %v4602_v23 = vld [vmem:[%s5283_s5 + $0x10] sm:$0xff]  ;;  %p4266_p12 = scmp.ne.s32.totalorder %s5233_s20, %s4265_s28  ;;  %s4330_s19 = smov [#allocation7]  }
  0x26   : > { %3810 = vmatprep.subr.msk.mxu1 %vm597_vm1, %v564_v1  ;;  %3875 = vmatpush3.msra.mxu0 %v4511_v10  ;;  %v4584_v21 = vld [vmem:[#allocation2] sm:$0xff]  ;;  %v4611_v24 = vld [vmem:[%s5283_s5 + $0x8] sm:$0xff]  ;;  %s4269_s22 = sshll.u32 %s4330_s19, 4  ;;  %s4270_s22 = int_to_ptr.vmem [resolvable:$false] %s4269_s22 }
  0x27   : > { %3811 = vmatpush3.msk.msra.mxu1 %vm597_vm1, %v564_v1  ;;  %3843 = vmatprep.mubr.msk.f32.mxu0 %vm572_vm2, %v558_v5  ;;  %v4621_v25 = vld [vmem:[%s5283_s5] sm:$0xff]  ;;  %p4267_p13 = pnand %p4266_p12, %p4461_p5  ;;  %s4271_s24 = scalar_lea.vmem %s4270_s22, 2048 }
  0x28   : > { %3813 = vmatmul.mubr.msk.f32.vlgmr.msra.gmra.mxu1 %vm572_vm2, %v557_v3  ;;  %3824 = vmatprep.subr.msk.mxu1 %vm597_vm1, %v706_v4  ;;  %v3546_v26 = vld [vmem:[%s5285_s7] ss:$0 sm:$0xff]  ;;  %p4272_p1 = scmp.lt.s32.totalorder %s5233_s20, %s4270_s22  ;;  %p4273_p2 = scmp.lt.s32.totalorder %s4271_s24, %s4265_s28 }
  0x29   : > { %3825 = vmatpush3.msk.msra.mxu1 %vm597_vm1, %v706_v4  ;;  %3815 = vmatprep.mubr.msk.f32.mxu1 %vm572_vm2, %v558_v5  ;;  %v3566_v32 = vld [vmem:[%s5287_s9] ss:$0 sm:$0xff]  ;;  %p4268_p0 = pneg %p4267_p13 }
  0x2a   : > { %3852 = vmatprep.subr.mxu1 %v4328_v8  ;;  %3876 = vmatprep.subr.mxu0 %v4328_v8  ;;  %v3556_v51 = vld [vmem:[%s5286_s8] ss:$0 sm:$0xff]  ;;  %p4274_p3 = por %p4273_p2, %p4272_p1 }
  0x2b   : > { %3877 = vmatpush3.msra.mxu0 %v4522_v13 }
  0x2c   : > { %3816 = vmatmul.mubr.msk.f32.gmra.mxu1 %vm572_vm2, %v559_v6  ;;  %3844 = vmatmul.mubr.msk.f32.gmra.mxu0 %vm572_vm2, %v559_v6  ;;  %p4275_p4 = pnand %p4274_p3, %p4268_p0 }
  0x2d   : > { %3818 = vmatprep.mubr.msk.f32.mxu1 %vm572_vm2, %v560_v7  ;;  %3878 = vmatprep.subr.mxu0 %v4328_v8 }
  0x2e   : > { %3846 = vmatprep.mubr.msk.f32.mxu0 %vm572_vm2, %v560_v7  ;;  %3879 = vmatpush3.msra.mxu0 %v4531_v14 }
  0x2f   : > { %3880 = vmatprep.subr.mxu0 %v4328_v8 }
  0x30   : > { %3819 = vmatmul.mubr.msk.f32.gmra.mxu1 %vm572_vm2, %v561_v11  ;;  %3881 = vmatpush3.msra.mxu0 %v4541_v16 }
  0x31   : > { %3821 = vmatprep.mubr.msk.f32.mxu1 %vm572_vm2, %v562_v12  ;;  %3847 = vmatmul.mubr.msk.f32.gmra.mxu0 %vm572_vm2, %v561_v11 }
  0x32   : > { %3896 = vmatprep.subr.mxu0 %v4328_v8  ;;  %3849 = vmatprep.mubr.msk.f32.mxu0 %vm572_vm2, %v562_v12 }
  0x34   : > { %3822 = vmatmul.mubr.msk.f32.gmra.mxu1 %vm572_vm2, %v563_v15 }
  0x35   : > { %3826 = vmatprep.mubr.msk.f32.mxu1 %vm572_vm2, %v556_v2  ;;  %3850 = vmatmul.mubr.msk.f32.gmra.mxu0 %vm572_vm2, %v563_v15 }
  0x36   : > { %3882 = vmatprep.mubr.msk.f32.mxu0 %vm4329_vm3, %v4328_v8 }
  0x38   : > { %3827 = vmatmul.mubr.msk.f32.vlgmr.msra.gmra.mxu1 %vm572_vm2, %v557_v3 }
  0x39   : > { %3853 = vmatpush3.msra.mxu1 %v4552_v17  ;;  %3829 = vmatprep.mubr.msk.f32.mxu1 %vm572_vm2, %v558_v5 }
  0x3a   : > { %3854 = vmatprep.subr.mxu1 %v4328_v8  ;;  %3883 = vmatmul.mubr.msk.f32.vlgmr.msra.gmra.mxu0 %vm938_vm4, %v4584_v21 }
  0x3b   : > { %3855 = vmatpush3.msra.mxu1 %v4561_v18  ;;  %3897 = vmatpush3.msra.mxu0 %v4590_v22 }
  0x3c   : > { %3830 = vmatmul.mubr.msk.f32.gmra.mxu1 %vm572_vm2, %v559_v6  ;;  %3856 = vmatprep.subr.mxu1 %v4328_v8 }
  0x3d   : > { %3832 = vmatprep.mubr.msk.f32.mxu1 %vm572_vm2, %v560_v7  ;;  %3857 = vmatpush3.msra.mxu1 %v4569_v19 }
  0x3e   : > { %3858 = vmatprep.subr.mxu1 %v4328_v8  ;;  %3898 = vmatprep.subr.mxu0 %v4328_v8 }
  0x3f   : > { %3859 = vmatpush3.msra.mxu1 %v4580_v20  ;;  %3899 = vmatpush3.msra.mxu0 %v4602_v23 }
  0x40   : > { %3833 = vmatmul.mubr.msk.f32.gmra.mxu1 %vm572_vm2, %v561_v11  ;;  %3863 = vmatprep.subr.mxu1 %v4328_v8 }
  0x41   : > { %3835 = vmatprep.mubr.msk.f32.mxu1 %vm572_vm2, %v562_v12  ;;  %3904 = vmatprep.mubr.msk.f32.mxu0 %vm4329_vm3, %v4328_v8 }
  0x42   : > { %3900 = vmatprep.subr.mxu0 %v4328_v8 }
  0x43   : > { %3901 = vmatpush3.msra.mxu0 %v4611_v24 }
  0x44   : > { %3836 = vmatmul.mubr.msk.f32.gmra.mxu1 %vm572_vm2, %v563_v15  ;;  %3902 = vmatprep.subr.mxu0 %v4328_v8 }
  0x45   : > { %3860 = vmatprep.mubr.msk.f32.mxu1 %vm4329_vm3, %v4328_v8  ;;  %3903 = vmatpush3.msra.mxu0 %v4621_v25 }
  0x46   : > { %3918 = vmatprep.subr.mxu0 %v4328_v8 }
  0x48   : > { %3861 = vmatmul.mubr.msk.f32.vlgmr.msra.gmra.mxu1 %vm938_vm4, %v4584_v21 }
  0x49   : > { %3864 = vmatpush3.msra.mxu1 %v4590_v22  ;;  %3871 = vmatprep.mubr.msk.f32.mxu1 %vm4329_vm3, %v4328_v8 }
  0x4a   : > { %3865 = vmatprep.subr.mxu1 %v4328_v8 }
  0x4b   : > { %3866 = vmatpush3.msra.mxu1 %v4602_v23 }
  0x4c   : > { %3867 = vmatprep.subr.mxu1 %v4328_v8 }
  0x4d   : > { %3868 = vmatpush3.msra.mxu1 %v4611_v24 }
  0x4e   : > { %3869 = vmatprep.subr.mxu1 %v4328_v8 }
  0x4f   : > { %3870 = vmatpush3.msra.mxu1 %v4621_v25 }
  0x50   : > { %3872 = vmatmul.mubr.msk.f32.vlgmr.msra.gmra.mxu1 %vm938_vm4, %v4584_v21  ;;  %3885 = vmatprep.subr.mxu1 %v4328_v8 }
  0x51   : > { %3886 = vmatpush3.msra.mxu1 %v4552_v17  ;;  %3893 = vmatprep.mubr.msk.f32.mxu1 %vm4329_vm3, %v4328_v8 }
  0x52   : > { %3887 = vmatprep.subr.mxu1 %v4328_v8 }
  0x53   : > { %3888 = vmatpush3.msra.mxu1 %v4561_v18 }
  0x54   : > { %3889 = vmatprep.subr.mxu1 %v4328_v8 }
  0x55   : > { %3890 = vmatpush3.msra.mxu1 %v4569_v19 }
  0x56   : > { %3891 = vmatprep.subr.mxu1 %v4328_v8 }
  0x57   : > { %3892 = vmatpush3.msra.mxu1 %v4580_v20 }
  0x58   : > { %3907 = vmatprep.subr.mxu1 %v4328_v8 }
  0xe5   : > { %v3842_v35 = vpop.f32.mrf.mxu0 }
  0xe6   : > { %v905_v37 = vadd.f32 %v3842_v35, %v3566_v32 }
  0xe7   : > { %v899_v39 = vpop.f32.mrf.mxu0 }
  0xe8   : > { %v3814_v27 = vpop.f32.mrf.mxu1  ;;  %956 = vst.msk [vmem:[#allocation5 + $0x8] sm:$0xff] %vm938_vm4, %v905_v37  ;;  %v900_v41 = vadd.f32 %v3566_v32, %v899_v39 }
  0xe9   : > { %v673_v28 = vadd.f32 %v3814_v27, %v3546_v26 }
  0xea   : > { %v667_v29 = vpop.f32.mrf.mxu1  ;;  %955 = vst.msk [vmem:[#allocation5] sm:$0xff] %vm938_vm4, %v900_v41 }
  0xeb   : > { %940 = vst.msk [vmem:[#allocation3 + $0x8] sm:$0xff] %vm938_vm4, %v673_v28  ;;  %v668_v30 = vadd.f32 %v3546_v26, %v667_v29 }
  0xec   : > { %v3817_v31 = vpop.f32.mrf.mxu1  ;;  %v3845_v43 = vpop.f32.mrf.mxu0 }
  0xed   : > { %939 = vst.msk [vmem:[#allocation3] sm:$0xff] %vm938_vm4, %v668_v30  ;;  %v683_v33 = vadd.f32 %v3817_v31, %v3546_v26  ;;  %v915_v45 = vadd.f32 %v3845_v43, %v3566_v32 }
  0xee   : > { %v677_v34 = vpop.f32.mrf.mxu1  ;;  %v909_v47 = vpop.f32.mrf.mxu0 }
  0xef   : > { %942 = vst.msk [vmem:[#allocation3 + $0x18] sm:$0xff] %vm938_vm4, %v683_v33  ;;  %v678_v36 = vadd.f32 %v3546_v26, %v677_v34  ;;  %958 = vst.msk [vmem:[#allocation5 + $0x18] sm:$0xff] %vm938_vm4, %v915_v45  ;;  %v910_v49 = vadd.f32 %v3566_v32, %v909_v47 }
  0xf0   : > { %v3820_v38 = vpop.f32.mrf.mxu1 }
  0xf1   : > { %941 = vst.msk [vmem:[#allocation3 + $0x10] sm:$0xff] %vm938_vm4, %v678_v36  ;;  %v693_v40 = vadd.f32 %v3820_v38, %v3546_v26  ;;  %v3848_v52 = vpop.f32.mrf.mxu0  ;;  %957 = vst.msk [vmem:[#allocation5 + $0x10] sm:$0xff] %vm938_vm4, %v910_v49  ;;  %v1136_v47 = vld [vmem:[#allocation5] sm:$0xff] }
  0xf2   : > { %v687_v42 = vpop.f32.mrf.mxu1  ;;  %v925_v54 = vadd.f32 %v3848_v52, %v3566_v32 }
  0xf3   : > { %944 = vst.msk [vmem:[#allocation3 + $0x28] sm:$0xff] %vm938_vm4, %v693_v40  ;;  %v688_v44 = vadd.f32 %v3546_v26, %v687_v42  ;;  %v919_v56 = vpop.f32.mrf.mxu0  ;;  %v4686_v42 = vld [vmem:[%s5288_s10] ss:$0 sm:$0xff] }
  0xf4   : > { %v3823_v46 = vpop.f32.mrf.mxu1  ;;  %960 = vst.msk [vmem:[#allocation5 + $0x28] sm:$0xff] %vm938_vm4, %v925_v54  ;;  %v920_v58 = vadd.f32 %v3566_v32, %v919_v56  ;;  %v1120_v30 = vld [vmem:[#allocation3] sm:$0xff]  ;;  %v1367_v56 = vld [vmem:[#allocation3 + $0x8] sm:$0xff] }
  0xf5   : > { %943 = vst.msk [vmem:[#allocation3 + $0x20] sm:$0xff] %vm938_vm4, %v688_v44  ;;  %v703_v48 = vadd.f32 %v3823_v46, %v3546_v26  ;;  %v3851_v60 = vpop.f32.mrf.mxu0 }
  0xf6   : > { %v697_v50 = vpop.f32.mrf.mxu1  ;;  %959 = vst.msk [vmem:[#allocation5 + $0x20] sm:$0xff] %vm938_vm4, %v920_v58  ;;  %v935_v62 = vadd.f32 %v3851_v60, %v3566_v32 }
  0xf7   : > { %946 = vst.msk [vmem:[#allocation3 + $0x38] sm:$0xff] %vm938_vm4, %v703_v48  ;;  %v698_v53 = vadd.f32 %v3546_v26, %v697_v50  ;;  %v929_v0 = vpop.f32.mrf.mxu0 }
  0xf8   : > { %v3828_v55 = vpop.f32.mrf.mxu1  ;;  %962 = vst.msk [vmem:[#allocation5 + $0x38] sm:$0xff] %vm938_vm4, %v935_v62  ;;  %v930_v2 = vadd.f32 %v3566_v32, %v929_v0 }
  0xf9   : > { %945 = vst.msk [vmem:[#allocation3 + $0x30] sm:$0xff] %vm938_vm4, %v698_v53  ;;  %v789_v57 = vadd.f32 %v3828_v55, %v3556_v51 }
  0xfa   : > { %v783_v59 = vpop.f32.mrf.mxu1  ;;  %v1209_v4 = vpop.f32.mrf.mxu0  ;;  %961 = vst.msk [vmem:[#allocation5 + $0x30] sm:$0xff] %vm938_vm4, %v930_v2 }
  0xfb   : > { %948 = vst.msk [vmem:[#allocation4 + $0x8] sm:$0xff] %vm938_vm4, %v789_v57  ;;  %v784_v61 = vadd.f32 %v3556_v51, %v783_v59  ;;  %v1210_v44 = vadd.f32 %v4686_v42, %v1209_v4 }
  0xfc   : > { %v3831_v63 = vpop.f32.mrf.mxu1  ;;  %v3884_v7 = vpop.f32.mrf.mxu0 }
  0xfd   : > { %947 = vst.msk [vmem:[#allocation4] sm:$0xff] %vm938_vm4, %v784_v61  ;;  %v799_v1 = vadd.f32 %v3831_v63, %v3556_v51 }
  0xfe   : > { %v793_v3 = vpop.f32.mrf.mxu1 }
  0xff   : > { %950 = vst.msk [vmem:[#allocation4 + $0x18] sm:$0xff] %vm938_vm4, %v799_v1  ;;  %v794_v5 = vadd.f32 %v3556_v51, %v793_v3 }
 0x100   : > { %v3834_v6 = vpop.f32.mrf.mxu1 }
 0x101   : > { %949 = vst.msk [vmem:[#allocation4 + $0x10] sm:$0xff] %vm938_vm4, %v794_v5  ;;  %v809_v9 = vadd.f32 %v3834_v6, %v3556_v51 }
 0x102   : > { %v803_v11 = vpop.f32.mrf.mxu1  ;;  %v1376_v62 = vld [vmem:[#allocation4 + $0x8] sm:$0xff] }
 0x103   : > { %952 = vst.msk [vmem:[#allocation4 + $0x28] sm:$0xff] %vm938_vm4, %v809_v9  ;;  %v804_v12 = vadd.f32 %v3556_v51, %v803_v11 }
 0x104   : > { %v3837_v15 = vpop.f32.mrf.mxu1  ;;  %v1128_v35 = vld [vmem:[#allocation4] sm:$0xff] }
 0x105   : > { %951 = vst.msk [vmem:[#allocation4 + $0x20] sm:$0xff] %vm938_vm4, %v804_v12  ;;  %v819_v26 = vadd.f32 %v3837_v15, %v3556_v51  ;;  %v1385_v12 = vld [vmem:[#allocation5 + $0x8] sm:$0xff] }
 0x106   : > { %v813_v27 = vpop.f32.mrf.mxu1 }
 0x107   : > { %954 = vst.msk [vmem:[#allocation4 + $0x38] sm:$0xff] %vm938_vm4, %v819_v26  ;;  %v814_v28 = vadd.f32 %v3556_v51, %v813_v27 }
 0x108   : > { %v1046_v29 = vpop.f32.mrf.mxu1 }
 0x109   : > { %953 = vst.msk [vmem:[#allocation4 + $0x30] sm:$0xff] %vm938_vm4, %v814_v28  ;;  %v1121_v31 = vadd.f32 %v1120_v30, %v1046_v29 }
 0x10a   : > { %v3862_v32 = vpop.f32.mrf.mxu1 }
 0x10b   : > { %v3578_v33 = vmul.f32 -1.442695, %v1121_v31 }
 0x10d   : > { %4180 = vpow2.f32 %v3578_v33 }
 0x110   : > { %v1116_v34 = vpop.f32.mrf.mxu1 }
 0x111   : > { %v1129_v36 = vadd.f32 %v1128_v35, %v1116_v34  ;;  %v1611_v34 = vld [vmem:[#allocation3 + $0x10] sm:$0xff] }
 0x112   : > { %v3873_v37 = vpop.f32.mrf.mxu1 }
 0x113   : > { %v3579_v38 = vmul.f32 -1.442695, %v1129_v36 }
 0x115   : > { %4182 = vpow2.f32 %v3579_v38 }
 0x11a   : > { %v4181_v39 = vpop.eup %4180 }
 0x11b   : > { %v1125_v40 = vadd.f32 1.0, %v4181_v39 }
 0x11d   : > { %4184 = vrcp.f32 %v1125_v40  ;;  %v1620_v40 = vld [vmem:[#allocation4 + $0x10] sm:$0xff] }
 0x122   : > { %v4183_v41 = vpop.eup %4182 }
 0x123   : > { %v1133_v43 = vadd.f32 1.0, %v4183_v41 }
 0x125   : > { %4186 = vrcp.f32 %v1133_v43 }
 0x12a   : > { %v4185_v45 = vpop.eup %4184 }
 0x12b   : > { %v1213_v46 = vmul.f32 %v4185_v45, %v1210_v44 }
 0x12d   : > { %v1214_v48 = vadd.f32 %v1213_v46, %v1136_v47 }
 0x12f   : > { %4188 = vtanh.f32 %v1214_v48 }
 0x132   : > { %v4187_v49 = vpop.eup %4186 }
 0x133   : > { %v1216_v50 = vsub.f32 1.0, %v4187_v49  ;;  %v1218_v52 = vmul.f32 %v4187_v49, %v4584_v21 }
 0x13c   : > { %v4189_v51 = vpop.eup %4188 }
 0x13d   : > { %v1217_v53 = vmul.f32 %v4189_v51, %v1216_v50 }
 0x13f   : > { %v1219_v54 = vadd.f32 %v1218_v52, %v1217_v53  ;;  %v1629_v53 = vld [vmem:[#allocation5 + $0x10] sm:$0xff] }
 0x141   : > { %1220 = vst.msk [vmem:[#allocation2] sm:$0xff] %vm938_vm4, %v1219_v54  ;;  %1221 = vst.msk [vmem:[#allocation6] sm:$0xff] %vm938_vm4, %v1219_v54 }
 0x148   : > { %v1222_v55 = vld [vmem:[#allocation2] sm:$0xff] }
 0x149   : > { %3894 = vmatmul.mubr.msk.f32.vlgmr.msra.gmra.mxu1 %vm938_vm4, %v1222_v55  ;;  %3905 = vmatmul.mubr.msk.f32.vlgmr.msra.gmra.mxu0 %vm938_vm4, %v1222_v55 }
 0x14a   : > { %3908 = vmatpush3.msra.mxu1 %v4511_v10  ;;  %3915 = vmatprep.mubr.msk.f32.mxu1 %vm4329_vm3, %v4328_v8 }
 0x14b   : > { %3909 = vmatprep.subr.mxu1 %v4328_v8  ;;  %3919 = vmatpush3.msra.mxu0 %v4552_v17 }
 0x14c   : > { %3910 = vmatpush3.msra.mxu1 %v4522_v13  ;;  %3920 = vmatprep.subr.mxu0 %v4328_v8 }
 0x14d   : > { %3911 = vmatprep.subr.mxu1 %v4328_v8  ;;  %3921 = vmatpush3.msra.mxu0 %v4561_v18 }
 0x14e   : > { %3912 = vmatpush3.msra.mxu1 %v4531_v14  ;;  %3922 = vmatprep.subr.mxu0 %v4328_v8 }
 0x14f   : > { %3913 = vmatprep.subr.mxu1 %v4328_v8  ;;  %3923 = vmatpush3.msra.mxu0 %v4569_v19 }
 0x150   : > { %3914 = vmatpush3.msra.mxu1 %v4541_v16  ;;  %3924 = vmatprep.subr.mxu0 %v4328_v8 }
 0x151   : > { %3916 = vmatmul.mubr.msk.f32.vlgmr.msra.gmra.mxu1 %vm938_vm4, %v1222_v55  ;;  %3929 = vmatprep.subr.mxu1 %v4328_v8 }
 0x152   : > { %3930 = vmatpush3.msra.mxu1 %v4590_v22  ;;  %3925 = vmatpush3.msra.mxu0 %v4580_v20 }
 0x153   : > { %3931 = vmatprep.subr.mxu1 %v4328_v8  ;;  %3926 = vmatprep.mubr.msk.f32.mxu0 %vm4329_vm3, %v4328_v8 }
 0x154   : > { %3932 = vmatpush3.msra.mxu1 %v4602_v23  ;;  %3937 = vmatprep.mubr.msk.f32.mxu1 %vm4329_vm3, %v4328_v8 }
 0x155   : > { %3933 = vmatprep.subr.mxu1 %v4328_v8  ;;  %3940 = vmatprep.subr.mxu0 %v4328_v8 }
 0x156   : > { %3934 = vmatpush3.msra.mxu1 %v4611_v24 }
 0x157   : > { %3935 = vmatprep.subr.mxu1 %v4328_v8 }
 0x158   : > { %3936 = vmatpush3.msra.mxu1 %v4621_v25 }
 0x159   : > { %3951 = vmatprep.subr.mxu1 %v4328_v8 }
 0x209   : > { %v1292_v21 = vpop.f32.mrf.mxu1  ;;  %v1362_v57 = vpop.f32.mrf.mxu0 }
 0x20a   : > { %v1368_v58 = vadd.f32 %v1367_v56, %v1292_v21  ;;  %v1377_v63 = vadd.f32 %v1376_v62, %v1362_v57  ;;  %v1855_v62 = vld [vmem:[#allocation3 + $0x18] sm:$0xff] }
 0x20b   : > { %v3895_v59 = vpop.f32.mrf.mxu1  ;;  %v3906_v60 = vpop.f32.mrf.mxu0 }
 0x20c   : > { %v3584_v61 = vmul.f32 -1.442695, %v1368_v58  ;;  %v3585_v2 = vmul.f32 -1.442695, %v1377_v63 }
 0x20e   : > { %4190 = vpow2.f32 %v3584_v61 }
 0x20f   : > { %4192 = vpow2.f32 %v3585_v2 }
 0x211   : > { %v1452_v0 = vpop.f32.mrf.mxu1 }
 0x212   : > { %v1453_v7 = vadd.f32 %v4686_v42, %v1452_v0 }
 0x213   : > { %v3917_v1 = vpop.f32.mrf.mxu1 }
 0x21b   : > { %v4191_v3 = vpop.eup %4190 }
 0x21c   : > { %v1372_v4 = vadd.f32 1.0, %v4191_v3  ;;  %v4193_v5 = vpop.eup %4192 }
 0x21d   : > { %v1381_v6 = vadd.f32 1.0, %v4193_v5 }
 0x21e   : > { %4194 = vrcp.f32 %v1372_v4  ;;  %v1864_v4 = vld [vmem:[#allocation4 + $0x18] sm:$0xff] }
 0x21f   : > { %4196 = vrcp.f32 %v1381_v6 }
 0x22b   : > { %v4195_v9 = vpop.eup %4194 }
 0x22c   : > { %v1456_v11 = vmul.f32 %v4195_v9, %v1453_v7  ;;  %v4197_v26 = vpop.eup %4196 }
 0x22d   : > { %v1459_v27 = vsub.f32 1.0, %v4197_v26  ;;  %v1461_v29 = vmul.f32 %v4197_v26, %v1222_v55 }
 0x22e   : > { %v1457_v15 = vadd.f32 %v1456_v11, %v1385_v12 }
 0x230   : > { %4198 = vtanh.f32 %v1457_v15 }
 0x23d   : > { %v4199_v28 = vpop.eup %4198 }
 0x23e   : > { %v1460_v30 = vmul.f32 %v4199_v28, %v1459_v27 }
 0x240   : > { %v1462_v31 = vadd.f32 %v1461_v29, %v1460_v30  ;;  %v1873_v30 = vld [vmem:[#allocation5 + $0x18] sm:$0xff] }
 0x242   : > { %1463 = vst.msk [vmem:[#allocation2] sm:$0xff] %vm938_vm4, %v1462_v31  ;;  %1465 = vst.msk [vmem:[#allocation6 + $0x8] sm:$0xff] %vm938_vm4, %v1462_v31 }
 0x249   : > { %v1466_v32 = vld [vmem:[#allocation2] sm:$0xff] }
 0x24a   : > { %3927 = vmatmul.mubr.msk.f32.vlgmr.msra.gmra.mxu0 %vm938_vm4, %v1466_v32  ;;  %3938 = vmatmul.mubr.msk.f32.vlgmr.msra.gmra.mxu1 %vm938_vm4, %v1466_v32 }
 0x24b   : > { %3941 = vmatpush3.msra.mxu0 %v4511_v10  ;;  %3948 = vmatprep.mubr.msk.f32.mxu0 %vm4329_vm3, %v4328_v8 }
 0x24c   : > { %3942 = vmatprep.subr.mxu0 %v4328_v8  ;;  %3952 = vmatpush3.msra.mxu1 %v4552_v17 }
 0x24d   : > { %3943 = vmatpush3.msra.mxu0 %v4522_v13  ;;  %3953 = vmatprep.subr.mxu1 %v4328_v8 }
 0x24e   : > { %3944 = vmatprep.subr.mxu0 %v4328_v8  ;;  %3954 = vmatpush3.msra.mxu1 %v4561_v18 }
 0x24f   : > { %3945 = vmatpush3.msra.mxu0 %v4531_v14  ;;  %3955 = vmatprep.subr.mxu1 %v4328_v8 }
 0x250   : > { %3946 = vmatprep.subr.mxu0 %v4328_v8  ;;  %3956 = vmatpush3.msra.mxu1 %v4569_v19 }
 0x251   : > { %3947 = vmatpush3.msra.mxu0 %v4541_v16  ;;  %3957 = vmatprep.subr.mxu1 %v4328_v8 }
 0x252   : > { %3949 = vmatmul.mubr.msk.f32.vlgmr.msra.gmra.mxu0 %vm938_vm4, %v1466_v32  ;;  %3962 = vmatprep.subr.mxu0 %v4328_v8 }
 0x253   : > { %3963 = vmatpush3.msra.mxu0 %v4590_v22  ;;  %3958 = vmatpush3.msra.mxu1 %v4580_v20 }
 0x254   : > { %3964 = vmatprep.subr.mxu0 %v4328_v8  ;;  %3959 = vmatprep.mubr.msk.f32.mxu1 %vm4329_vm3, %v4328_v8 }
 0x255   : > { %3965 = vmatpush3.msra.mxu0 %v4602_v23  ;;  %3970 = vmatprep.mubr.msk.f32.mxu0 %vm4329_vm3, %v4328_v8 }
 0x256   : > { %3966 = vmatprep.subr.mxu0 %v4328_v8  ;;  %3973 = vmatprep.subr.mxu1 %v4328_v8 }
 0x257   : > { %3967 = vmatpush3.msra.mxu0 %v4611_v24 }
 0x258   : > { %3968 = vmatprep.subr.mxu0 %v4328_v8 }
 0x259   : > { %3969 = vmatpush3.msra.mxu0 %v4621_v25 }
 0x25a   : > { %3984 = vmatprep.subr.mxu0 %v4328_v8 }
 0x30a   : > { %v1536_v33 = vpop.f32.mrf.mxu0  ;;  %v1606_v35 = vpop.f32.mrf.mxu1 }
 0x30b   : > { %v1612_v36 = vadd.f32 %v1611_v34, %v1536_v33  ;;  %v1621_v41 = vadd.f32 %v1620_v40, %v1606_v35  ;;  %v2099_v40 = vld [vmem:[#allocation3 + $0x20] sm:$0xff] }
 0x30c   : > { %v3928_v37 = vpop.f32.mrf.mxu0  ;;  %v3939_v38 = vpop.f32.mrf.mxu1 }
 0x30d   : > { %v3589_v39 = vmul.f32 -1.442695, %v1612_v36  ;;  %v3590_v45 = vmul.f32 -1.442695, %v1621_v41 }
 0x30f   : > { %4200 = vpow2.f32 %v3589_v39 }
 0x310   : > { %4202 = vpow2.f32 %v3590_v45 }
 0x312   : > { %v1696_v43 = vpop.f32.mrf.mxu0 }
 0x313   : > { %v1697_v50 = vadd.f32 %v4686_v42, %v1696_v43 }
 0x314   : > { %v3950_v44 = vpop.f32.mrf.mxu0 }
 0x31c   : > { %v4201_v46 = vpop.eup %4200 }
 0x31d   : > { %v1616_v47 = vadd.f32 1.0, %v4201_v46  ;;  %v4203_v48 = vpop.eup %4202 }
 0x31e   : > { %v1625_v49 = vadd.f32 1.0, %v4203_v48 }
 0x31f   : > { %4204 = vrcp.f32 %v1616_v47  ;;  %v2108_v47 = vld [vmem:[#allocation4 + $0x20] sm:$0xff] }
 0x320   : > { %4206 = vrcp.f32 %v1625_v49 }
 0x32c   : > { %v4205_v51 = vpop.eup %4204 }
 0x32d   : > { %v1700_v52 = vmul.f32 %v4205_v51, %v1697_v50  ;;  %v4207_v55 = vpop.eup %4206 }
 0x32e   : > { %v1703_v21 = vsub.f32 1.0, %v4207_v55  ;;  %v1705_v57 = vmul.f32 %v4207_v55, %v1466_v32 }
 0x32f   : > { %v1701_v54 = vadd.f32 %v1700_v52, %v1629_v53 }
 0x331   : > { %4208 = vtanh.f32 %v1701_v54 }
 0x33e   : > { %v4209_v56 = vpop.eup %4208 }
 0x33f   : > { %v1704_v58 = vmul.f32 %v4209_v56, %v1703_v21 }
 0x341   : > { %v1706_v59 = vadd.f32 %v1705_v57, %v1704_v58  ;;  %v2117_v58 = vld [vmem:[#allocation5 + $0x20] sm:$0xff] }
 0x343   : > { %1707 = vst.msk [vmem:[#allocation2] sm:$0xff] %vm938_vm4, %v1706_v59  ;;  %1709 = vst.msk [vmem:[#allocation6 + $0x10] sm:$0xff] %vm938_vm4, %v1706_v59 }
 0x34a   : > { %v1710_v60 = vld [vmem:[#allocation2] sm:$0xff] }
 0x34b   : > { %3960 = vmatmul.mubr.msk.f32.vlgmr.msra.gmra.mxu1 %vm938_vm4, %v1710_v60  ;;  %3971 = vmatmul.mubr.msk.f32.vlgmr.msra.gmra.mxu0 %vm938_vm4, %v1710_v60 }
 0x34c   : > { %3974 = vmatpush3.msra.mxu1 %v4511_v10  ;;  %3981 = vmatprep.mubr.msk.f32.mxu1 %vm4329_vm3, %v4328_v8 }
 0x34d   : > { %3975 = vmatprep.subr.mxu1 %v4328_v8  ;;  %3985 = vmatpush3.msra.mxu0 %v4552_v17 }
 0x34e   : > { %3976 = vmatpush3.msra.mxu1 %v4522_v13  ;;  %3986 = vmatprep.subr.mxu0 %v4328_v8 }
 0x34f   : > { %3977 = vmatprep.subr.mxu1 %v4328_v8  ;;  %3987 = vmatpush3.msra.mxu0 %v4561_v18 }
 0x350   : > { %3978 = vmatpush3.msra.mxu1 %v4531_v14  ;;  %3988 = vmatprep.subr.mxu0 %v4328_v8 }
 0x351   : > { %3979 = vmatprep.subr.mxu1 %v4328_v8  ;;  %3989 = vmatpush3.msra.mxu0 %v4569_v19 }
 0x352   : > { %3980 = vmatpush3.msra.mxu1 %v4541_v16  ;;  %3990 = vmatprep.subr.mxu0 %v4328_v8 }
 0x353   : > { %3982 = vmatmul.mubr.msk.f32.vlgmr.msra.gmra.mxu1 %vm938_vm4, %v1710_v60  ;;  %3995 = vmatprep.subr.mxu1 %v4328_v8 }
 0x354   : > { %3996 = vmatpush3.msra.mxu1 %v4590_v22  ;;  %3991 = vmatpush3.msra.mxu0 %v4580_v20 }
 0x355   : > { %3997 = vmatprep.subr.mxu1 %v4328_v8  ;;  %3992 = vmatprep.mubr.msk.f32.mxu0 %vm4329_vm3, %v4328_v8 }
 0x356   : > { %3998 = vmatpush3.msra.mxu1 %v4602_v23  ;;  %4003 = vmatprep.mubr.msk.f32.mxu1 %vm4329_vm3, %v4328_v8 }
 0x357   : > { %3999 = vmatprep.subr.mxu1 %v4328_v8  ;;  %4006 = vmatprep.subr.mxu0 %v4328_v8 }
 0x358   : > { %4000 = vmatpush3.msra.mxu1 %v4611_v24 }
 0x359   : > { %4001 = vmatprep.subr.mxu1 %v4328_v8 }
 0x35a   : > { %4002 = vmatpush3.msra.mxu1 %v4621_v25 }
 0x35b   : > { %4017 = vmatprep.subr.mxu1 %v4328_v8 }
 0x40b   : > { %v1780_v61 = vpop.f32.mrf.mxu1  ;;  %v1850_v63 = vpop.f32.mrf.mxu0 }
 0x40c   : > { %v1856_v0 = vadd.f32 %v1855_v62, %v1780_v61  ;;  %v1865_v5 = vadd.f32 %v1864_v4, %v1850_v63 }
 0x40d   : > { %v3961_v1 = vpop.f32.mrf.mxu1  ;;  %v3972_v2 = vpop.f32.mrf.mxu0 }
 0x40e   : > { %v3594_v3 = vmul.f32 -1.442695, %v1856_v0  ;;  %v3595_v9 = vmul.f32 -1.442695, %v1865_v5 }
 0x410   : > { %4210 = vpow2.f32 %v3594_v3 }
 0x411   : > { %4212 = vpow2.f32 %v3595_v9 }
 0x413   : > { %v1940_v6 = vpop.f32.mrf.mxu1 }
 0x414   : > { %v1941_v27 = vadd.f32 %v4686_v42, %v1940_v6  ;;  %v2352_v6 = vld [vmem:[#allocation4 + $0x28] sm:$0xff] }
 0x415   : > { %v3983_v7 = vpop.f32.mrf.mxu1 }
 0x41d   : > { %v4211_v11 = vpop.eup %4210 }
 0x41e   : > { %v1860_v12 = vadd.f32 1.0, %v4211_v11  ;;  %v4213_v15 = vpop.eup %4212 }
 0x41f   : > { %v1869_v26 = vadd.f32 1.0, %v4213_v15 }
 0x420   : > { %4214 = vrcp.f32 %v1860_v12 }
 0x421   : > { %4216 = vrcp.f32 %v1869_v26 }
 0x42d   : > { %v4215_v28 = vpop.eup %4214 }
 0x42e   : > { %v1944_v29 = vmul.f32 %v4215_v28, %v1941_v27  ;;  %v4217_v32 = vpop.eup %4216 }
 0x42f   : > { %v1947_v33 = vsub.f32 1.0, %v4217_v32  ;;  %v1949_v35 = vmul.f32 %v4217_v32, %v1710_v60  ;;  %v2361_v32 = vld [vmem:[#allocation5 + $0x28] sm:$0xff] }
 0x430   : > { %v1945_v31 = vadd.f32 %v1944_v29, %v1873_v30 }
 0x432   : > { %4218 = vtanh.f32 %v1945_v31 }
 0x43f   : > { %v4219_v34 = vpop.eup %4218 }
 0x440   : > { %v1948_v36 = vmul.f32 %v4219_v34, %v1947_v33 }
 0x442   : > { %v1950_v37 = vadd.f32 %v1949_v35, %v1948_v36 }
 0x444   : > { %1951 = vst.msk [vmem:[#allocation2] sm:$0xff] %vm938_vm4, %v1950_v37  ;;  %1953 = vst.msk [vmem:[#allocation6 + $0x18] sm:$0xff] %vm938_vm4, %v1950_v37 }
 0x44b   : > { %v1954_v38 = vld [vmem:[#allocation2] sm:$0xff] }
 0x44c   : > { %3993 = vmatmul.mubr.msk.f32.vlgmr.msra.gmra.mxu0 %vm938_vm4, %v1954_v38  ;;  %4004 = vmatmul.mubr.msk.f32.vlgmr.msra.gmra.mxu1 %vm938_vm4, %v1954_v38 }
 0x44d   : > { %4007 = vmatpush3.msra.mxu0 %v4511_v10  ;;  %4014 = vmatprep.mubr.msk.f32.mxu0 %vm4329_vm3, %v4328_v8 }
 0x44e   : > { %4008 = vmatprep.subr.mxu0 %v4328_v8  ;;  %4018 = vmatpush3.msra.mxu1 %v4552_v17 }
 0x44f   : > { %4009 = vmatpush3.msra.mxu0 %v4522_v13  ;;  %4019 = vmatprep.subr.mxu1 %v4328_v8 }
 0x450   : > { %4010 = vmatprep.subr.mxu0 %v4328_v8  ;;  %4020 = vmatpush3.msra.mxu1 %v4561_v18 }
 0x451   : > { %4011 = vmatpush3.msra.mxu0 %v4531_v14  ;;  %4021 = vmatprep.subr.mxu1 %v4328_v8 }
 0x452   : > { %4012 = vmatprep.subr.mxu0 %v4328_v8  ;;  %4022 = vmatpush3.msra.mxu1 %v4569_v19 }
 0x453   : > { %4013 = vmatpush3.msra.mxu0 %v4541_v16  ;;  %4023 = vmatprep.subr.mxu1 %v4328_v8 }
 0x454   : > { %4015 = vmatmul.mubr.msk.f32.vlgmr.msra.gmra.mxu0 %vm938_vm4, %v1954_v38  ;;  %4028 = vmatprep.subr.mxu0 %v4328_v8 }
 0x455   : > { %4029 = vmatpush3.msra.mxu0 %v4590_v22  ;;  %4024 = vmatpush3.msra.mxu1 %v4580_v20 }
 0x456   : > { %4030 = vmatprep.subr.mxu0 %v4328_v8  ;;  %4025 = vmatprep.mubr.msk.f32.mxu1 %vm4329_vm3, %v4328_v8 }
 0x457   : > { %4031 = vmatpush3.msra.mxu0 %v4602_v23  ;;  %4036 = vmatprep.mubr.msk.f32.mxu0 %vm4329_vm3, %v4328_v8 }
 0x458   : > { %4032 = vmatprep.subr.mxu0 %v4328_v8  ;;  %4039 = vmatprep.subr.mxu1 %v4328_v8 }
 0x459   : > { %4033 = vmatpush3.msra.mxu0 %v4611_v24 }
 0x45a   : > { %4034 = vmatprep.subr.mxu0 %v4328_v8 }
 0x45b   : > { %4035 = vmatpush3.msra.mxu0 %v4621_v25 }
 0x45c   : > { %4050 = vmatprep.subr.mxu0 %v4328_v8 }
 0x50c   : > { %v2024_v39 = vpop.f32.mrf.mxu0  ;;  %v2094_v41 = vpop.f32.mrf.mxu1 }
 0x50d   : > { %v2100_v43 = vadd.f32 %v2099_v40, %v2024_v39  ;;  %v2109_v48 = vadd.f32 %v2108_v47, %v2094_v41  ;;  %v4881_v41 = vld [vmem:[%s5284_s6 + $0x18] sm:$0xff] }
 0x50e   : > { %v3994_v44 = vpop.f32.mrf.mxu0  ;;  %v4005_v45 = vpop.f32.mrf.mxu1 }
 0x50f   : > { %v3599_v46 = vmul.f32 -1.442695, %v2100_v43  ;;  %v3600_v51 = vmul.f32 -1.442695, %v2109_v48  ;;  %v4891_v43 = vld [vmem:[%s5284_s6 + $0x10] sm:$0xff]  ;;  %v4900_v44 = vld [vmem:[%s5284_s6 + $0x8] sm:$0xff] }
 0x510   : > { %v2596_v48 = vld [vmem:[#allocation4 + $0x30] sm:$0xff] }
 0x511   : > { %4220 = vpow2.f32 %v3599_v46 }
 0x512   : > { %4222 = vpow2.f32 %v3600_v51 }
 0x514   : > { %v2184_v49 = vpop.f32.mrf.mxu0 }
 0x515   : > { %v2185_v21 = vadd.f32 %v4686_v42, %v2184_v49 }
 0x516   : > { %v4016_v50 = vpop.f32.mrf.mxu0 }
 0x51e   : > { %v4221_v52 = vpop.eup %4220 }
 0x51f   : > { %v2104_v53 = vadd.f32 1.0, %v4221_v52  ;;  %v4223_v54 = vpop.eup %4222 }
 0x520   : > { %v2113_v55 = vadd.f32 1.0, %v4223_v54 }
 0x521   : > { %4224 = vrcp.f32 %v2104_v53 }
 0x522   : > { %4226 = vrcp.f32 %v2113_v55 }
 0x52e   : > { %v4225_v56 = vpop.eup %4224 }
 0x52f   : > { %v2188_v57 = vmul.f32 %v4225_v56, %v2185_v21  ;;  %v4227_v60 = vpop.eup %4226 }
 0x530   : > { %v2191_v61 = vsub.f32 1.0, %v4227_v60  ;;  %v2193_v63 = vmul.f32 %v4227_v60, %v1954_v38 }
 0x531   : > { %v2189_v59 = vadd.f32 %v2188_v57, %v2117_v58  ;;  %v2605_v57 = vld [vmem:[#allocation5 + $0x30] sm:$0xff] }
 0x533   : > { %4228 = vtanh.f32 %v2189_v59 }
 0x540   : > { %v4229_v62 = vpop.eup %4228 }
 0x541   : > { %v2192_v0 = vmul.f32 %v4229_v62, %v2191_v61 }
 0x543   : > { %v2194_v1 = vadd.f32 %v2193_v63, %v2192_v0 }
 0x545   : > { %2195 = vst.msk [vmem:[#allocation2] sm:$0xff] %vm938_vm4, %v2194_v1  ;;  %2197 = vst.msk [vmem:[#allocation6 + $0x20] sm:$0xff] %vm938_vm4, %v2194_v1  ;;  %v2930_v1 = vld [vmem:[#allocation6] sm:$0xff] }
 0x54c   : > { %v2198_v2 = vld [vmem:[#allocation2] sm:$0xff] }
 0x54d   : > { %4026 = vmatmul.mubr.msk.f32.vlgmr.msra.gmra.mxu1 %vm938_vm4, %v2198_v2  ;;  %4037 = vmatmul.mubr.msk.f32.vlgmr.msra.gmra.mxu0 %vm938_vm4, %v2198_v2 }
 0x54e   : > { %4040 = vmatpush3.msra.mxu1 %v4511_v10  ;;  %4047 = vmatprep.mubr.msk.f32.mxu1 %vm4329_vm3, %v4328_v8 }
 0x54f   : > { %4041 = vmatprep.subr.mxu1 %v4328_v8  ;;  %4051 = vmatpush3.msra.mxu0 %v4552_v17 }
 0x550   : > { %4042 = vmatpush3.msra.mxu1 %v4522_v13  ;;  %4052 = vmatprep.subr.mxu0 %v4328_v8  ;;  %v2343_v13 = vld [vmem:[#allocation3 + $0x28] sm:$0xff] }
 0x551   : > { %4043 = vmatprep.subr.mxu1 %v4328_v8  ;;  %4053 = vmatpush3.msra.mxu0 %v4561_v18 }
 0x552   : > { %4044 = vmatpush3.msra.mxu1 %v4531_v14  ;;  %4054 = vmatprep.subr.mxu0 %v4328_v8 }
 0x553   : > { %4045 = vmatprep.subr.mxu1 %v4328_v8  ;;  %4055 = vmatpush3.msra.mxu0 %v4569_v19 }
 0x554   : > { %4046 = vmatpush3.msra.mxu1 %v4541_v16  ;;  %4056 = vmatprep.subr.mxu0 %v4328_v8 }
 0x555   : > { %4048 = vmatmul.mubr.msk.f32.vlgmr.msra.gmra.mxu1 %vm938_vm4, %v2198_v2  ;;  %4061 = vmatprep.subr.mxu1 %v4328_v8 }
 0x556   : > { %4062 = vmatpush3.msra.mxu1 %v4590_v22  ;;  %4057 = vmatpush3.msra.mxu0 %v4580_v20 }
 0x557   : > { %4063 = vmatprep.subr.mxu1 %v4328_v8  ;;  %4058 = vmatprep.mubr.msk.f32.mxu0 %vm4329_vm3, %v4328_v8 }
 0x558   : > { %4064 = vmatpush3.msra.mxu1 %v4602_v23  ;;  %4069 = vmatprep.mubr.msk.f32.mxu1 %vm4329_vm3, %v4328_v8 }
 0x559   : > { %4065 = vmatprep.subr.mxu1 %v4328_v8  ;;  %4072 = vmatprep.subr.mxu0 %v4328_v8 }
 0x55a   : > { %4066 = vmatpush3.msra.mxu1 %v4611_v24 }
 0x55b   : > { %4067 = vmatprep.subr.mxu1 %v4328_v8 }
 0x55c   : > { %4068 = vmatpush3.msra.mxu1 %v4621_v25 }
 0x55d   : > { %4083 = vmatprep.subr.mxu1 %v4328_v8 }
 0x60d   : > { %v2268_v10 = vpop.f32.mrf.mxu1  ;;  %v2338_v14 = vpop.f32.mrf.mxu0 }
 0x60e   : > { %v2344_v16 = vadd.f32 %v2343_v13, %v2268_v10  ;;  %v2353_v7 = vadd.f32 %v2352_v6, %v2338_v14  ;;  %v2938_v10 = vmax.f32 %v2930_v1, 0.0  ;;  %v2947_v13 = vld [vmem:[%s5289_s11 + $0x8] sm:$0xff]  ;;  %v2946_v14 = vld [vmem:[%s5289_s11] sm:$0xff] }
 0x60f   : > { %v4027_v3 = vpop.f32.mrf.mxu1  ;;  %v4038_v4 = vpop.f32.mrf.mxu0  ;;  %v3313_v1 = vld [vmem:[%s5293_s15 + $0xa8] sm:$0xff] }
 0x610   : > { %v3604_v5 = vmul.f32 -1.442695, %v2344_v16  ;;  %v3605_v12 = vmul.f32 -1.442695, %v2353_v7  ;;  %v2931_v16 = vld [vmem:[#allocation6 + $0x8] sm:$0xff]  ;;  %v2932_v3 = vld [vmem:[#allocation6 + $0x10] sm:$0xff] }
 0x611   : > { %v2939_v4 = vmax.f32 %v2931_v16, 0.0  ;;  %v2940_v6 = vmax.f32 %v2932_v3, 0.0  ;;  %v2933_v7 = vld [vmem:[#allocation6 + $0x18] sm:$0xff] }
 0x612   : > { %4230 = vpow2.f32 %v3604_v5  ;;  %v3119_v5 = vld [vmem:[%s5291_s13 + $0xc8] sm:$0xf] }
 0x613   : > { %4232 = vpow2.f32 %v3605_v12  ;;  %v3117_v12 = vld [vmem:[%s5291_s13 + $0xb8] sm:$0xff] }
 0x615   : > { %v2428_v9 = vpop.f32.mrf.mxu1 }
 0x616   : > { %v2429_v29 = vadd.f32 %v4686_v42, %v2428_v9  ;;  %v3118_v9 = vld [vmem:[%s5291_s13 + $0xc0] sm:$0xf] }
 0x617   : > { %v4049_v11 = vpop.f32.mrf.mxu1 }
 0x618   : > { %v2934_v11 = vld [vmem:[#allocation6 + $0x20] sm:$0xff] }
 0x61f   : > { %v4231_v15 = vpop.eup %4230 }
 0x620   : > { %v2348_v26 = vadd.f32 1.0, %v4231_v15  ;;  %v4233_v27 = vpop.eup %4232  ;;  %v3116_v15 = vld [vmem:[%s5291_s13 + $0xb0] sm:$0xff] }
 0x621   : > { %v2357_v28 = vadd.f32 1.0, %v4233_v27  ;;  %v3115_v27 = vld [vmem:[%s5291_s13 + $0xa8] sm:$0xff] }
 0x622   : > { %4234 = vrcp.f32 %v2348_v26  ;;  %v2941_v26 = vmax.f32 %v2933_v7, 0.0 }
 0x623   : > { %4236 = vrcp.f32 %v2357_v28  ;;  %v2942_v28 = vmax.f32 %v2934_v11, 0.0 }
 0x62f   : > { %v4235_v30 = vpop.eup %4234 }
 0x630   : > { %v2432_v31 = vmul.f32 %v4235_v30, %v2429_v29  ;;  %v4237_v34 = vpop.eup %4236  ;;  %v3114_v30 = vld [vmem:[%s5291_s13 + $0xa0] sm:$0xff] }
 0x631   : > { %v2435_v35 = vsub.f32 1.0, %v4237_v34  ;;  %v2437_v37 = vmul.f32 %v4237_v34, %v2198_v2 }
 0x632   : > { %v2433_v33 = vadd.f32 %v2432_v31, %v2361_v32  ;;  %v3113_v32 = vld [vmem:[%s5291_s13 + $0x98] sm:$0xff] }
 0x634   : > { %4238 = vtanh.f32 %v2433_v33  ;;  %v3112_v33 = vld [vmem:[%s5291_s13 + $0x90] sm:$0xff] }
 0x641   : > { %v4239_v36 = vpop.eup %4238 }
 0x642   : > { %v2436_v38 = vmul.f32 %v4239_v36, %v2435_v35  ;;  %v3111_v35 = vld [vmem:[%s5291_s13 + $0x88] sm:$0xff] }
 0x644   : > { %v2438_v39 = vadd.f32 %v2437_v37, %v2436_v38  ;;  %v3110_v37 = vld [vmem:[%s5291_s13 + $0x80] sm:$0xff]  ;;  %v3109_v38 = vld [vmem:[%s5291_s13 + $0x78] sm:$0xff] }
 0x646   : > { %2439 = vst.msk [vmem:[#allocation2] sm:$0xff] %vm938_vm4, %v2438_v39  ;;  %2441 = vst.msk [vmem:[#allocation6 + $0x28] sm:$0xff] %vm938_vm4, %v2438_v39  ;;  %v3108_v39 = vld [vmem:[%s5291_s13 + $0x70] sm:$0xff] }
 0x64d   : > { %v4872_v40 = vld [vmem:[#allocation2] sm:$0xff]  ;;  %v2935_v29 = vld [vmem:[#allocation6 + $0x28] sm:$0xff] }
 0x64e   : > { %4059 = vmatmul.mubr.msk.f32.vlgmr.msra.gmra.mxu0 %vm938_vm4, %v4872_v40  ;;  %4070 = vmatmul.mubr.msk.f32.vlgmr.msra.gmra.mxu1 %vm938_vm4, %v4872_v40  ;;  %v2943_v34 = vmax.f32 %v2935_v29, 0.0 }
 0x64f   : > { %4073 = vmatpush3.msra.mxu0 %v4881_v41  ;;  %4080 = vmatprep.mubr.msk.f32.mxu0 %vm4329_vm3, %v4328_v8 }
 0x650   : > { %4074 = vmatprep.subr.mxu0 %v4328_v8  ;;  %4084 = vmatpush3.msra.mxu1 %v4552_v17  ;;  %v4909_v17 = vld [vmem:[%s5284_s6] sm:$0xff] }
 0x651   : > { %4075 = vmatpush3.msra.mxu0 %v4891_v43  ;;  %4085 = vmatprep.subr.mxu1 %v4328_v8 }
 0x652   : > { %4076 = vmatprep.subr.mxu0 %v4328_v8  ;;  %4086 = vmatpush3.msra.mxu1 %v4561_v18  ;;  %v2949_v18 = vld [vmem:[%s5289_s11 + $0x18] sm:$0xff] }
 0x653   : > { %4077 = vmatpush3.msra.mxu0 %v4900_v44  ;;  %4087 = vmatprep.subr.mxu1 %v4328_v8 }
 0x654   : > { %4078 = vmatprep.subr.mxu0 %v4328_v8  ;;  %4088 = vmatpush3.msra.mxu1 %v4569_v19 }
 0x655   : > { %4079 = vmatpush3.msra.mxu0 %v4909_v17  ;;  %4089 = vmatprep.subr.mxu1 %v4328_v8 }
 0x656   : > { %4081 = vmatmul.mubr.msk.f32.vlgmr.msra.gmra.mxu0 %vm938_vm4, %v4872_v40  ;;  %4094 = vmatprep.subr.mxu0 %v4328_v8 }
 0x657   : > { %4095 = vmatpush3.msra.mxu0 %v4590_v22  ;;  %4090 = vmatpush3.msra.mxu1 %v4580_v20  ;;  %v2587_v20 = vld [vmem:[#allocation3 + $0x30] sm:$0xff] }
 0x658   : > { %4096 = vmatprep.subr.mxu0 %v4328_v8  ;;  %4091 = vmatprep.mubr.msk.f32.mxu1 %vm4329_vm3, %v4328_v8 }
 0x659   : > { %4097 = vmatpush3.msra.mxu0 %v4602_v23  ;;  %4102 = vmatprep.mubr.msk.f32.mxu0 %vm4329_vm3, %v4328_v8 }
 0x65a   : > { %4098 = vmatprep.subr.mxu0 %v4328_v8  ;;  %4105 = vmatprep.subr.mxu1 %v4328_v8 }
 0x65b   : > { %4099 = vmatpush3.msra.mxu0 %v4611_v24 }
 0x65c   : > { %4100 = vmatprep.subr.mxu0 %v4328_v8 }
 0x65d   : > { %4101 = vmatpush3.msra.mxu0 %v4621_v25 }
 0x65e   : > { %4116 = vmatprep.subr.mxu0 %v2949_v18 }
 0x70e   : > { %v2512_v19 = vpop.f32.mrf.mxu0  ;;  %v2582_v22 = vpop.f32.mrf.mxu1 }
 0x70f   : > { %v2588_v23 = vadd.f32 %v2587_v20, %v2512_v19  ;;  %v2597_v49 = vadd.f32 %v2596_v48, %v2582_v22  ;;  %v3101_v19 = vld [vmem:[%s5291_s13 + $0x38] sm:$0xff]  ;;  %v3100_v20 = vld [vmem:[%s5291_s13 + $0x30] sm:$0xff]  ;;  %v3099_v22 = vld [vmem:[%s5291_s13 + $0x28] sm:$0xff] }
 0x710   : > { %v4060_v45 = vpop.f32.mrf.mxu0  ;;  %v4071_v46 = vpop.f32.mrf.mxu1  ;;  %v3094_v48 = vld [vmem:[%s5291_s13] sm:$0xff] }
 0x711   : > { %v3609_v47 = vmul.f32 -1.442695, %v2588_v23  ;;  %v3610_v51 = vmul.f32 -1.442695, %v2597_v49  ;;  %v3098_v23 = vld [vmem:[%s5291_s13 + $0x20] sm:$0xff]  ;;  %v3097_v45 = vld [vmem:[%s5291_s13 + $0x18] sm:$0xff] }
 0x712   : > { %v3096_v46 = vld [vmem:[%s5291_s13 + $0x10] sm:$0xff]  ;;  %v3307_v49 = vld [vmem:[%s5293_s15 + $0x78] sm:$0xff] }
 0x713   : > { %4240 = vpow2.f32 %v3609_v47  ;;  %v3095_v47 = vld [vmem:[%s5291_s13 + $0x8] sm:$0xff] }
 0x714   : > { %4242 = vpow2.f32 %v3610_v51  ;;  %v3304_v51 = vld [vmem:[%s5293_s15 + $0x60] sm:$0xff] }
 0x716   : > { %v2672_v24 = vpop.f32.mrf.mxu0 }
 0x717   : > { %v2673_v55 = vadd.f32 %v4686_v42, %v2672_v24  ;;  %v2948_v42 = vld [vmem:[%s5289_s11 + $0x10] sm:$0xff] }
 0x718   : > { %v4082_v50 = vpop.f32.mrf.mxu0  ;;  %v3306_v24 = vld [vmem:[%s5293_s15 + $0x70] sm:$0xff] }
 0x719   : > { %v3305_v50 = vld [vmem:[%s5293_s15 + $0x68] sm:$0xff] }
 0x720   : > { %v4241_v25 = vpop.eup %4240 }
 0x721   : > { %v2592_v52 = vadd.f32 1.0, %v4241_v25  ;;  %v4243_v53 = vpop.eup %4242  ;;  %v3303_v25 = vld [vmem:[%s5293_s15 + $0x58] sm:$0xff] }
 0x722   : > { %v2601_v54 = vadd.f32 1.0, %v4243_v53  ;;  %v3301_v53 = vld [vmem:[%s5293_s15 + $0x48] sm:$0xff] }
 0x723   : > { %4244 = vrcp.f32 %v2592_v52  ;;  %v3302_v52 = vld [vmem:[%s5293_s15 + $0x50] sm:$0xff] }
 0x724   : > { %4246 = vrcp.f32 %v2601_v54  ;;  %v3300_v54 = vld [vmem:[%s5293_s15 + $0x40] sm:$0xff] }
 0x730   : > { %v4245_v21 = vpop.eup %4244 }
 0x731   : > { %v2676_v56 = vmul.f32 %v4245_v21, %v2673_v55  ;;  %v4247_v59 = vpop.eup %4246  ;;  %v3299_v55 = vld [vmem:[%s5293_s15 + $0x38] sm:$0xff]  ;;  %v3298_v21 = vld [vmem:[%s5293_s15 + $0x30] sm:$0xff] }
 0x732   : > { %v2679_v60 = vsub.f32 1.0, %v4247_v59  ;;  %v2681_v62 = vmul.f32 %v4247_v59, %v4872_v40  ;;  %v3107_v40 = vld [vmem:[%s5291_s13 + $0x68] sm:$0xff]  ;;  %v3294_v59 = vld [vmem:[%s5293_s15 + $0x10] sm:$0xff] }
 0x733   : > { %v2677_v58 = vadd.f32 %v2676_v56, %v2605_v57  ;;  %v3297_v56 = vld [vmem:[%s5293_s15 + $0x28] sm:$0xff]  ;;  %v3296_v57 = vld [vmem:[%s5293_s15 + $0x20] sm:$0xff] }
 0x735   : > { %4248 = vtanh.f32 %v2677_v58  ;;  %v3295_v58 = vld [vmem:[%s5293_s15 + $0x18] sm:$0xff] }
 0x742   : > { %v4249_v61 = vpop.eup %4248 }
 0x743   : > { %v2680_v63 = vmul.f32 %v4249_v61, %v2679_v60  ;;  %v3293_v60 = vld [vmem:[%s5293_s15 + $0x8] sm:$0xff]  ;;  %v3292_v61 = vld [vmem:[%s5293_s15] sm:$0xff] }
 0x745   : > { %v2682_v0 = vadd.f32 %v2681_v62, %v2680_v63  ;;  %v3316_v62 = vld [vmem:[%s5293_s15 + $0xc0] sm:$0xff]  ;;  %v3315_v63 = vld [vmem:[%s5293_s15 + $0xb8] sm:$0xff] }
 0x747   : > { %2683 = vst.msk [vmem:[#allocation2] sm:$0xff] %vm938_vm4, %v2682_v0  ;;  %2685 = vst.msk [vmem:[#allocation6 + $0x30] sm:$0xff] %vm938_vm4, %v2682_v0  ;;  %v3314_v0 = vld [vmem:[%s5293_s15 + $0xb0] sm:$0xff] }
 0x74e   : > { %v4936_v2 = vld [vmem:[#allocation2] sm:$0xff]  ;;  %v2936_v31 = vld [vmem:[#allocation6 + $0x30] sm:$0xff] }
 0x74f   : > { %4092 = vmatmul.mubr.msk.f32.vlgmr.msra.gmra.mxu1 %vm938_vm4, %v4936_v2  ;;  %4103 = vmatmul.mubr.msk.f32.vlgmr.msra.gmra.mxu0 %vm938_vm4, %v4936_v2  ;;  %v2944_v36 = vmax.f32 %v2936_v31, 0.0 }
 0x750   : > { %4106 = vmatpush3.msra.mxu1 %v4881_v41  ;;  %4117 = vmatpush3.msra.mxu0 %v2949_v18  ;;  %v3106_v41 = vld [vmem:[%s5291_s13 + $0x60] sm:$0xff] }
 0x751   : > { %4107 = vmatprep.subr.mxu1 %v4328_v8  ;;  %4118 = vmatprep.subr.mxu0 %v2948_v42  ;;  %v3102_v18 = vld [vmem:[%s5291_s13 + $0x40] sm:$0xff] }
 0x752   : > { %4124 = vmatprep.mubr.msk.f32.mxu0 %vm938_vm4, %v2938_v10  ;;  %4108 = vmatpush3.msra.mxu1 %v4891_v43  ;;  %v3105_v43 = vld [vmem:[%s5291_s13 + $0x58] sm:$0xff] }
 0x753   : > { %4119 = vmatpush3.msra.mxu0 %v2948_v42  ;;  %4109 = vmatprep.subr.mxu1 %v4328_v8  ;;  %v3312_v42 = vld [vmem:[%s5293_s15 + $0xa0] sm:$0xff] }
 0x754   : > { %4120 = vmatprep.subr.mxu0 %v2947_v13  ;;  %4110 = vmatpush3.msra.mxu1 %v4900_v44  ;;  %v3104_v44 = vld [vmem:[%s5291_s13 + $0x50] sm:$0xff] }
 0x755   : > { %4121 = vmatpush3.msra.mxu0 %v2947_v13  ;;  %4111 = vmatprep.subr.mxu1 %v4328_v8  ;;  %v2831_v13 = vld [vmem:[#allocation3 + $0x38] sm:$0xff] }
 0x756   : > { %4122 = vmatprep.subr.mxu0 %v2946_v14  ;;  %4112 = vmatpush3.msra.mxu1 %v4909_v17  ;;  %v3103_v17 = vld [vmem:[%s5291_s13 + $0x48] sm:$0xff] }
 0x757   : > { %4113 = vmatprep.mubr.msk.f32.mxu1 %vm4329_vm3, %v4328_v8  ;;  %4123 = vmatpush3.msra.mxu0 %v2946_v14 }
 0x758   : > { %4114 = vmatmul.mubr.msk.f32.vlgmr.msra.gmra.mxu1 %vm938_vm4, %v4936_v2  ;;  %4125 = vmatmul.mubr.msk.f32.vlgmr.msra.gmra.mxu0 %vm938_vm4, %v2939_v4 }
 0x759   : > { %4127 = vmatprep.mubr.msk.f32.mxu0 %vm938_vm4, %v2940_v6  ;;  %3626 = vmatprep.subr.msk.mxu1 %vm597_vm1, %v3119_v5  ;;  %v2840_v6 = vld [vmem:[#allocation4 + $0x38] sm:$0xff] }
 0x75a   : > { %3627 = vmatpush1.msk.msra.mxu1 %vm597_vm1, %v3118_v9  ;;  %3227 = vmatprep.mubr.f32.mxu1 %v4328_v8 }
 0x75b   : > { %3171 = vmatprep.subr.mxu1 %v3117_v12  ;;  %3349 = vmatprep.subr.mxu0 %v4328_v8 }
 0x75c   : > { %4128 = vmatmul.mubr.msk.f32.gmra.mxu0 %vm938_vm4, %v2941_v26  ;;  %3172 = vmatpush1.msra.mxu1 %v3116_v15  ;;  %v5138_v15 = vld [vmem:[%s5290_s12] ss:$0 sm:$0xff] }
 0x75d   : > { %4130 = vmatprep.mubr.msk.f32.mxu0 %vm938_vm4, %v2942_v28  ;;  %3173 = vmatprep.subr.mxu1 %v3115_v27 }
 0x75e   : > { %3174 = vmatpush1.msra.mxu1 %v3114_v30  ;;  %3350 = vmatpush1.msra.mxu0 %v3307_v49 }
 0x75f   : > { %3175 = vmatprep.subr.mxu1 %v3113_v32  ;;  %3351 = vmatprep.subr.mxu0 %v4328_v8 }
 0x760   : > { %4131 = vmatmul.mubr.msk.f32.gmra.mxu0 %vm938_vm4, %v2943_v34  ;;  %3176 = vmatpush1.msra.mxu1 %v3112_v33 }
 0x761   : > { %4133 = vmatprep.mubr.msk.f32.mxu0 %vm938_vm4, %v2944_v36  ;;  %3177 = vmatprep.subr.mxu1 %v3111_v35 }
 0x762   : > { %3178 = vmatpush1.msra.mxu1 %v3110_v37  ;;  %3352 = vmatpush1.msra.mxu0 %v3306_v24 }
 0x763   : > { %3179 = vmatprep.subr.mxu1 %v3109_v38  ;;  %3353 = vmatprep.subr.mxu0 %v4328_v8 }
 0x764   : > { %3180 = vmatpush1.msra.mxu1 %v3108_v39  ;;  %3354 = vmatpush1.msra.mxu0 %v3305_v50 }
 0x765   : > { %3181 = vmatprep.subr.mxu1 %v3107_v40  ;;  %3355 = vmatprep.subr.mxu0 %v4328_v8 }
 0x766   : > { %3182 = vmatpush1.msra.mxu1 %v3106_v41  ;;  %3356 = vmatpush1.msra.mxu0 %v3304_v51 }
 0x767   : > { %3183 = vmatprep.subr.mxu1 %v3105_v43  ;;  %3357 = vmatprep.subr.mxu0 %v4328_v8 }
 0x768   : > { %3184 = vmatpush1.msra.mxu1 %v3104_v44  ;;  %3358 = vmatpush1.msra.mxu0 %v3303_v25 }
 0x769   : > { %3185 = vmatprep.subr.mxu1 %v3103_v17  ;;  %3359 = vmatprep.subr.mxu0 %v4328_v8 }
 0x76a   : > { %3186 = vmatpush1.msra.mxu1 %v3102_v18  ;;  %3360 = vmatpush1.msra.mxu0 %v3302_v52 }
 0x76b   : > { %3187 = vmatprep.subr.mxu1 %v3101_v19  ;;  %3361 = vmatprep.subr.mxu0 %v4328_v8 }
 0x76c   : > { %3188 = vmatpush1.msra.mxu1 %v3100_v20  ;;  %3362 = vmatpush1.msra.mxu0 %v3301_v53  ;;  %v4264_v20 = vld [vmem:[%s5288_s10] ss:$0 sm:$0xff] }
 0x76d   : > { %3189 = vmatprep.subr.mxu1 %v3099_v22  ;;  %3363 = vmatprep.subr.mxu0 %v4328_v8 }
 0x76e   : > { %3190 = vmatpush1.msra.mxu1 %v3098_v23  ;;  %3364 = vmatpush1.msra.mxu0 %v3300_v54 }
 0x76f   : > { %3191 = vmatprep.subr.mxu1 %v3097_v45  ;;  %3365 = vmatprep.subr.mxu0 %v4328_v8 }
 0x770   : > { %3192 = vmatpush1.msra.mxu1 %v3096_v46  ;;  %3366 = vmatpush1.msra.mxu0 %v3299_v55  ;;  %v3311_v55 = vld [vmem:[%s5293_s15 + $0x98] sm:$0xff] }
 0x771   : > { %3193 = vmatprep.subr.mxu1 %v3095_v47  ;;  %3367 = vmatprep.subr.mxu0 %v4328_v8  ;;  %v2849_v47 = vld [vmem:[#allocation5 + $0x38] sm:$0xff] }
 0x772   : > { %3194 = vmatpush1.msra.mxu1 %v3094_v48  ;;  %3368 = vmatpush1.msra.mxu0 %v3298_v21  ;;  %v3309_v21 = vld [vmem:[%s5293_s15 + $0x88] sm:$0xff] }
 0x773   : > { %3369 = vmatprep.subr.mxu0 %v4328_v8 }
 0x774   : > { %3370 = vmatpush1.msra.mxu0 %v3297_v56  ;;  %v3308_v56 = vld [vmem:[%s5293_s15 + $0x80] sm:$0xff] }
 0x775   : > { %3371 = vmatprep.subr.mxu0 %v4328_v8 }
 0x776   : > { %3372 = vmatpush1.msra.mxu0 %v3296_v57  ;;  %v3122_v57 = vlaneseq }
 0x777   : > { %3373 = vmatprep.subr.mxu0 %v4328_v8 }
 0x778   : > { %3374 = vmatpush1.msra.mxu0 %v3295_v58  ;;  %v3123_v58 = vshrl.u32 %v3122_v57, 7 }
 0x779   : > { %3375 = vmatprep.subr.mxu0 %v4328_v8 }
 0x77a   : > { %3376 = vmatpush1.msra.mxu0 %v3294_v59  ;;  %v3124_v59 = vsub.s32 0, %v3123_v58 }
 0x77b   : > { %3377 = vmatprep.subr.mxu0 %v4328_v8 }
 0x77c   : > { %3378 = vmatpush1.msra.mxu0 %v3293_v60  ;;  %v3120_v60 = vld [vmem:[%s5292_s14] sm:$0x3] }
 0x77d   : > { %3379 = vmatprep.subr.mxu0 %v4328_v8 }
 0x77e   : > { %3380 = vmatpush1.msra.mxu0 %v3292_v61  ;;  %v3128_v61 = vsub.s32 1, %v3123_v58 }
 0x77f   : > { %3395 = vmatprep.subr.mxu0 %v4328_v8 }
 0x780   : > { %3396 = vmatpush2.msra.mxu0 %v3316_v62  ;;  %v5183_v62 = vrot.slane %v3120_v60, %v3124_v59 }
 0x781   : > { %3397 = vmatprep.subr.mxu0 %v4328_v8 }
 0x782   : > { %3398 = vmatpush2.msra.mxu0 %v3315_v63  ;;  %v5185_v63 = vrot.slane %v3120_v60, %v3128_v61 }
 0x783   : > { %3399 = vmatprep.subr.mxu0 %v4328_v8 }
 0x784   : > { %3400 = vmatpush2.msra.mxu0 %v3314_v0 }
 0x785   : > { %3401 = vmatprep.subr.mxu0 %v4328_v8 }
 0x786   : > { %3402 = vmatpush2.msra.mxu0 %v3313_v1 }
 0x787   : > { %3403 = vmatprep.subr.mxu0 %v4328_v8 }
 0x788   : > { %3404 = vmatpush2.msra.mxu0 %v3312_v42 }
 0x789   : > { %3405 = vmatprep.subr.mxu0 %v4328_v8 }
 0x78a   : > { %3406 = vmatpush2.msra.mxu0 %v3311_v55 }
 0x78b   : > { %3407 = vmatprep.subr.mxu0 %v4328_v8 }
 0x80f   : > { %v2756_v10 = vpop.f32.mrf.mxu1  ;;  %v2826_v14 = vpop.f32.mrf.mxu0 }
 0x810   : > { %v2832_v16 = vadd.f32 %v2831_v13, %v2756_v10  ;;  %v2841_v7 = vadd.f32 %v2840_v6, %v2826_v14 }
 0x811   : > { %v4093_v3 = vpop.f32.mrf.mxu1  ;;  %v4104_v4 = vpop.f32.mrf.mxu0 }
 0x812   : > { %v3614_v5 = vmul.f32 -1.442695, %v2832_v16  ;;  %v3615_v12 = vmul.f32 -1.442695, %v2841_v7 }
 0x814   : > { %4250 = vpow2.f32 %v3614_v5 }
 0x815   : > { %4252 = vpow2.f32 %v3615_v12 }
 0x818   : > { %v2916_v9 = vpop.f32.mrf.mxu1  ;;  %v4126_v11 = vpop.f32.mrf.mxu0 }
 0x819   : > { %v3053_v30 = vadd.f32 %v4126_v11, %v5138_v15  ;;  %v2917_v22 = vadd.f32 %v4264_v20, %v2916_v9 }
 0x81a   : > { %v4115_v26 = vpop.f32.mrf.mxu1  ;;  %v3047_v27 = vpop.f32.mrf.mxu0 }
 0x81b   : > { %v3048_v28 = vadd.f32 %v5138_v15, %v3047_v27  ;;  %v3087_v34 = vmax.f32 %v3053_v30, 0.0 }
 0x81c   : > { %v4129_v29 = vpop.f32.mrf.mxu0 }
 0x81d   : > { %v3086_v31 = vmax.f32 %v3048_v28, 0.0  ;;  %v3063_v38 = vadd.f32 %v4129_v29, %v5138_v15 }
 0x81e   : > { %v3057_v32 = vpop.f32.mrf.mxu0 }
 0x81f   : > { %3628 = vmatmul.mubr.msk.f32.vlgmr.msra.gmra.mxu1 %vm3132_vm5, %v3086_v31  ;;  %v3058_v35 = vadd.f32 %v5138_v15, %v3057_v32  ;;  %v3089_v41 = vmax.f32 %v3063_v38, 0.0 }
 0x820   : > { %3233 = vmatprep.mubr.f32.mxu1 %v4328_v8  ;;  %v4132_v37 = vpop.f32.mrf.mxu0 }
 0x821   : > { %v4251_v33 = vpop.eup %4250  ;;  %v3088_v39 = vmax.f32 %v3058_v35, 0.0  ;;  %v3073_v17 = vadd.f32 %v4132_v37, %v5138_v15 }
 0x822   : > { %v2836_v36 = vadd.f32 1.0, %v4251_v33  ;;  %v3067_v40 = vpop.f32.mrf.mxu0  ;;  %v4253_v44 = vpop.eup %4252 }
 0x823   : > { %3629 = vmatmul.mubr.msk.f32.gmra.mxu1 %vm3132_vm5, %v3087_v34  ;;  %v3068_v43 = vadd.f32 %v5138_v15, %v3067_v40  ;;  %v2845_v19 = vadd.f32 1.0, %v4253_v44  ;;  %v3091_v45 = vmax.f32 %v3073_v17, 0.0 }
 0x824   : > { %4254 = vrcp.f32 %v2836_v36  ;;  %3239 = vmatprep.mubr.f32.mxu1 %v4328_v8 }
 0x825   : > { %v3090_v18 = vmax.f32 %v3068_v43, 0.0  ;;  %4256 = vrcp.f32 %v2845_v19 }
 0x827   : > { %3630 = vmatmul.mubr.msk.f32.gmra.mxu1 %vm3132_vm5, %v3088_v39 }
 0x828   : > { %3245 = vmatprep.mubr.f32.mxu1 %v4328_v8 }
 0x82b   : > { %3631 = vmatmul.mubr.msk.f32.gmra.mxu1 %vm3132_vm5, %v3089_v41 }
 0x82c   : > { %3251 = vmatprep.mubr.f32.mxu1 %v4328_v8 }
 0x82f   : > { %3632 = vmatmul.mubr.msk.f32.gmra.mxu1 %vm3132_vm5, %v3090_v18 }
 0x830   : > { %3257 = vmatprep.mubr.f32.mxu1 %v4328_v8 }
 0x831   : > { %v4255_v23 = vpop.eup %4254 }
 0x832   : > { %v2920_v46 = vmul.f32 %v4255_v23, %v2917_v22  ;;  %v4257_v49 = vpop.eup %4256 }
 0x833   : > { %3633 = vmatmul.mubr.msk.f32.gmra.mxu1 %vm3132_vm5, %v3091_v45  ;;  %v2923_v24 = vsub.f32 1.0, %v4257_v49  ;;  %v2925_v51 = vmul.f32 %v4257_v49, %v4936_v2  ;;  %v3310_v2 = vld [vmem:[%s5293_s15 + $0x90] sm:$0xff] }
 0x834   : > { %v2921_v48 = vadd.f32 %v2920_v46, %v2849_v47  ;;  %3263 = vmatprep.mubr.f32.mxu1 %v4328_v8  ;;  %3408 = vmatpush2.msra.mxu0 %v3310_v2 }
 0x835   : > { %3409 = vmatprep.subr.mxu0 %v4328_v8 }
 0x836   : > { %4258 = vtanh.f32 %v2921_v48  ;;  %3410 = vmatpush2.msra.mxu0 %v3309_v21  ;;  %v3636_v48 = vld [vmem:[%s5294_s16] ss:$0 sm:$0xff] }
 0x837   : > { %3411 = vmatprep.subr.mxu0 %v4328_v8 }
 0x838   : > { %3412 = vmatpush2.msra.mxu0 %v3308_v56 }
 0x843   : > { %v4259_v50 = vpop.eup %4258 }
 0x844   : > { %v2924_v25 = vmul.f32 %v4259_v50, %v2923_v24 }
 0x846   : > { %v2926_v52 = vadd.f32 %v2925_v51, %v2924_v25 }
 0x848   : > { %2927 = vst.msk [vmem:[#allocation2] sm:$0xff] %vm938_vm4, %v2926_v52  ;;  %2929 = vst.msk [vmem:[#allocation6 + $0x38] sm:$0xff] %vm938_vm4, %v2926_v52 }
 0x84f   : > { %v2937_v53 = vld [vmem:[#allocation6 + $0x38] sm:$0xff] }
 0x850   : > { %v2945_v54 = vmax.f32 %v2937_v53, 0.0 }
 0x852   : > { %4134 = vmatmul.mubr.msk.f32.gmra.mxu0 %vm938_vm4, %v2945_v54 }
 0x8df   : > { %v3229_v0 = vpop.f32.mrf.mxu1 }
 0x8e0   : > { %v3230_v1 = vadd.f32 %v3229_v0, %v5183_v62 }
 0x8e1   : > { %v3231_v42 = vpop.f32.mrf.mxu1 }
 0x8e2   : > { %v3232_v10 = vadd.f32 %v3231_v42, %v5185_v63  ;;  %v3276_v16 = vmax.f32 %v3230_v1, 0.0 }
 0x8e3   : > { %v3235_v13 = vpop.f32.mrf.mxu1 }
 0x8e4   : > { %v3277_v14 = vmax.f32 %v3232_v10, 0.0  ;;  %v3236_v3 = vadd.f32 %v3235_v13, %v5183_v62 }
 0x8e5   : > { %v3237_v4 = vpop.f32.mrf.mxu1 }
 0x8e6   : > { %v3238_v5 = vadd.f32 %v3237_v4, %v5185_v63  ;;  %3637 = vmatprep.mubr.msk.f32.mxu0 %vm3324_vm6, %v3277_v14  ;;  %v3278_v9 = vmax.f32 %v3236_v3, 0.0 }
 0x8e7   : > { %v3241_v6 = vpop.f32.mrf.mxu1  ;;  %3414 = vmatmul.mubr.f32.vlgmr.msra.gmra.mxu0 %v3276_v16 }
 0x8e8   : > { %v3279_v7 = vmax.f32 %v3238_v5, 0.0  ;;  %v3242_v11 = vadd.f32 %v3241_v6, %v5183_v62 }
 0x8e9   : > { %v3243_v12 = vpop.f32.mrf.mxu1 }
 0x8ea   : > { %v3244_v26 = vadd.f32 %v3243_v12, %v5185_v63  ;;  %3638 = vmatprep.mubr.msk.f32.mxu0 %vm3324_vm6, %v3279_v7  ;;  %v3280_v29 = vmax.f32 %v3242_v11, 0.0 }
 0x8eb   : > { %v3247_v27 = vpop.f32.mrf.mxu1  ;;  %3419 = vmatmul.mubr.f32.gmra.mxu0 %v3278_v9 }
 0x8ec   : > { %v3281_v28 = vmax.f32 %v3244_v26, 0.0  ;;  %v3248_v30 = vadd.f32 %v3247_v27, %v5183_v62 }
 0x8ed   : > { %v3249_v31 = vpop.f32.mrf.mxu1 }
 0x8ee   : > { %v3250_v32 = vadd.f32 %v3249_v31, %v5185_v63  ;;  %3639 = vmatprep.mubr.msk.f32.mxu0 %vm3324_vm6, %v3281_v28  ;;  %v3282_v35 = vmax.f32 %v3248_v30, 0.0 }
 0x8ef   : > { %v3253_v33 = vpop.f32.mrf.mxu1  ;;  %3424 = vmatmul.mubr.f32.gmra.mxu0 %v3280_v29 }
 0x8f0   : > { %v3283_v34 = vmax.f32 %v3250_v32, 0.0  ;;  %v3254_v36 = vadd.f32 %v3253_v33, %v5183_v62 }
 0x8f1   : > { %v3255_v37 = vpop.f32.mrf.mxu1 }
 0x8f2   : > { %v3256_v38 = vadd.f32 %v3255_v37, %v5185_v63  ;;  %3640 = vmatprep.mubr.msk.f32.mxu0 %vm3324_vm6, %v3283_v34  ;;  %v3284_v41 = vmax.f32 %v3254_v36, 0.0 }
 0x8f3   : > { %v3259_v39 = vpop.f32.mrf.mxu1  ;;  %3429 = vmatmul.mubr.f32.gmra.mxu0 %v3282_v35 }
 0x8f4   : > { %v3285_v40 = vmax.f32 %v3256_v38, 0.0  ;;  %v3260_v43 = vadd.f32 %v3259_v39, %v5183_v62 }
 0x8f5   : > { %v3261_v44 = vpop.f32.mrf.mxu1 }
 0x8f6   : > { %v3262_v17 = vadd.f32 %v3261_v44, %v5185_v63  ;;  %3641 = vmatprep.mubr.msk.f32.mxu0 %vm3324_vm6, %v3285_v40  ;;  %v3286_v19 = vmax.f32 %v3260_v43, 0.0 }
 0x8f7   : > { %3434 = vmatmul.mubr.f32.gmra.mxu0 %v3284_v41 }
 0x8f8   : > { %v3287_v18 = vmax.f32 %v3262_v17, 0.0 }
 0x8fa   : > { %3642 = vmatprep.mubr.msk.f32.mxu0 %vm3324_vm6, %v3287_v18 }
 0x8fb   : > { %3439 = vmatmul.mubr.f32.gmra.mxu0 %v3286_v19 }
 0x912   : > { %v4135_v20 = vpop.f32.mrf.mxu0 }
 0x913   : > { %v3083_v45 = vadd.f32 %v4135_v20, %v5138_v15 }
 0x914   : > { %v3077_v22 = vpop.f32.mrf.mxu0 }
 0x915   : > { %v3078_v23 = vadd.f32 %v5138_v15, %v3077_v22  ;;  %v3093_v47 = vmax.f32 %v3083_v45, 0.0 }
 0x917   : > { %v3092_v46 = vmax.f32 %v3078_v23, 0.0 }
 0x919   : > { %3634 = vmatmul.mubr.msk.f32.gmra.mxu1 %vm3132_vm5, %v3092_v46 }
 0x91a   : > { %3269 = vmatprep.mubr.f32.mxu1 %v4328_v8 }
 0x91d   : > { %3635 = vmatmul.mubr.msk.f32.gmra.mxu1 %vm3132_vm5, %v3093_v47 }
 0x9a7   : > { %v3415_v49 = vpop.f32.mrf.mxu0 }
 0x9a8   : > { %v3416_v24 = vadd.f32 %v3636_v48, %v3415_v49 }
 0x9a9   : > { %v3417_v50 = vpop.f32.mrf.mxu0 }
 0x9aa   : > { %3454 = vst [vmem:[%s4480_s0] sm:$0xff] %v3416_v24 }
 0x9ab   : > { %v3420_v15 = vpop.f32.mrf.mxu0 }
 0x9ac   : > { %v3421_v51 = vadd.f32 %v3636_v48, %v3420_v15 }
 0x9ad   : > { %v3422_v25 = vpop.f32.mrf.mxu0 }
 0x9ae   : > { %3455 = vst [vmem:[%s4480_s0 + $0x8] sm:$0xff] %v3421_v51 }
 0x9af   : > { %v3425_v52 = vpop.f32.mrf.mxu0 }
 0x9b0   : > { %v3426_v8 = vadd.f32 %v3636_v48, %v3425_v52 }
 0x9b1   : > { %v3427_v53 = vpop.f32.mrf.mxu0 }
 0x9b2   : > { %3456 = vst [vmem:[%s4480_s0 + $0x10] sm:$0xff] %v3426_v8 }
 0x9b3   : > { %v3430_v54 = vpop.f32.mrf.mxu0 }
 0x9b4   : > { %v3431_v55 = vadd.f32 %v3636_v48, %v3430_v54 }
 0x9b5   : > { %v3432_v2 = vpop.f32.mrf.mxu0 }
 0x9b6   : > { %3457 = vst [vmem:[%s4480_s0 + $0x18] sm:$0xff] %v3431_v55 }
 0x9b7   : > { %v3435_v21 = vpop.f32.mrf.mxu0 }
 0x9b8   : > { %v3436_v56 = vadd.f32 %v3636_v48, %v3435_v21 }
 0x9b9   : > { %v3437_v57 = vpop.f32.mrf.mxu0 }
 0x9ba   : > { %3458 = vst [vmem:[%s4480_s0 + $0x20] sm:$0xff] %v3436_v56 }
 0x9bb   : > { %v3440_v58 = vpop.f32.mrf.mxu0 }
 0x9bc   : > { %v3441_v59 = vadd.f32 %v3636_v48, %v3440_v58 }
 0x9bd   : > { %v3442_v60 = vpop.f32.mrf.mxu0 }
 0x9be   : > { %3459 = vst [vmem:[%s4480_s0 + $0x28] sm:$0xff] %v3441_v59 }
 0x9d9   : > { %v3265_v61 = vpop.f32.mrf.mxu1 }
 0x9da   : > { %v3266_v0 = vadd.f32 %v3265_v61, %v5183_v62 }
 0x9db   : > { %v3267_v1 = vpop.f32.mrf.mxu1 }
 0x9dc   : > { %v3268_v42 = vadd.f32 %v3267_v1, %v5185_v63  ;;  %v3288_v14 = vmax.f32 %v3266_v0, 0.0 }
 0x9dd   : > { %v3271_v10 = vpop.f32.mrf.mxu1 }
 0x9de   : > { %v3289_v13 = vmax.f32 %v3268_v42, 0.0  ;;  %v3272_v16 = vadd.f32 %v3271_v10, %v5183_v62 }
 0x9df   : > { %v3273_v3 = vpop.f32.mrf.mxu1 }
 0x9e0   : > { %v3274_v4 = vadd.f32 %v3273_v3, %v5185_v63  ;;  %3643 = vmatprep.mubr.msk.f32.mxu0 %vm3324_vm6, %v3289_v13  ;;  %v3290_v6 = vmax.f32 %v3272_v16, 0.0 }
 0x9e1   : > { %3444 = vmatmul.mubr.f32.gmra.mxu0 %v3288_v14 }
 0x9e2   : > { %v3291_v5 = vmax.f32 %v3274_v4, 0.0 }
 0x9e4   : > { %3644 = vmatprep.mubr.msk.f32.mxu0 %vm3324_vm6, %v3291_v5 }
 0x9e5   : > { %3449 = vmatmul.mubr.f32.gmra.mxu0 %v3290_v6 }
 0xaa1   : > { %v3445_v7 = vpop.f32.mrf.mxu0 }
 0xaa2   : > { %v3446_v9 = vadd.f32 %v3636_v48, %v3445_v7 }
 0xaa3   : > { %v3447_v11 = vpop.f32.mrf.mxu0 }
 0xaa4   : > { %3460 = vst [vmem:[%s4480_s0 + $0x30] sm:$0xff] %v3446_v9 }
 0xaa5   : > { %v3450_v62 = vpop.f32.mrf.mxu0 }
 0xaa6   : > { %v3451_v63 = vadd.f32 %v3636_v48, %v3450_v62 }
 0xaa7   : > { %v3452_v12 = vpop.f32.mrf.mxu0 }
 0xaa8   : > { %3461 = vst [vmem:[%s4480_s0 + $0x38] sm:$0xff] %v3451_v63 }
 0xaa9   : > { %4278 = shalt.err (!%p4275_p4)
}
 0xaaa   : > { %s4279_s0 = scalar_lea.hbm %s5231_s29, 1024  ;;  %s4283_s23 = scalar_lea.hbm %s5295_s17, 2048 }
 0xaab   : > { %p4280_p7 = scmp.ne.s32.totalorder %s5231_s29, %s4279_s0  ;;  %p4284_p10 = scmp.lt.s32.totalorder %s5231_s29, %s5295_s17 }
 0xaac   : > { %p4285_p11 = scmp.lt.s32.totalorder %s4283_s23, %s4279_s0 }
 0xaad   : > { %p4281_p8 = pnand %p4280_p7, %p4461_p5 }
 0xaae   : > { %p4286_p12 = por %p4285_p11, %p4284_p10 }
 0xaaf   : > { %p4282_p9 = pneg %p4281_p8 }
 0xab1   : > { %p4287_p13 = pnand %p4286_p12, %p4282_p9 }
 0xab3   : > { %4290 = shalt.err (!%p4287_p13)
}
 0xab4   : > { %s4331_s28 = smov 128   ;;  %s4332_s22 = smov 8  }
 0xab5   : > { %4136 = dma.vmem_to_hbm [thread:$0]  (%p4461_p5), %s5233_s20, 1024, %s5231_s29, %s5238_s18, %s4331_s28, %s4331_s28, %s4332_s22  }
 0xab6 PF: > { %s5314_s24 = sld [smem:[#allocation10_spill]]  ;;  %p4142_p0 = scmp.ge.s32.totalorder %s4325_s27, 2 }
 0xab8   : > { %p4139_p1 = pnand %p4142_p0, %p4465_p6 }
 0xaba   : > { %p4140_p2 = pneg %p4139_p1 }
 0xabc   : > { %s3491_s21 = sand.u32 1, %s5314_s24  }
 0xabd   : > { %s3492_s0 = scalar_lea.sflag [#allocation8], %s3491_s21 }
 0xabe   : > { %4308 = dma.done.wait (%p4140_p2), %s3492_s0, 1024  }
 0xabf   : > { %4310 = vsyncadd (%p4140_p2), %s3492_s0, 4294966272  ;;  %s5316_s27 = sld [smem:[#allocation12_spill]]  ;;  %s5319_s24 = smov %s4317_s25 }
 0xac0   : > { %s5317_s23 = sld [smem:[#allocation11_spill]] }
 0xac1   : > { %s5318_s26 = sld [smem:[#allocation13_spill]] }
 0xac5   : > { %p27_p3 = scmp.ge.s32.totalorder %s5316_s27, 4  }
 0xac6   : > { %s5320_s25 = smov %s5317_s23 }
 0xac7   :  { %29 = sbr.rel (!%p27_p3) target bundleno = 6 (0x6), region = 155 }
 0xacc   :  { %3497 = vsyncpa [#allocation8], 1 }
 0xacd   :  { %3499 = vsyncpa [#allocation8 + $0x1], 1 }

</bundles_post_ra>
